<compile_context>
chip_gen: v7x
topology: tpu7x:2x2x1
jax: 0.10.0
libtpu: 0.0.40
codegen_flags: <defaults>
</compile_context>

<pallas_src>
from functools import partial

import numpy as np
import jax
import jax.numpy as jnp
from jax import lax
from jax.experimental import pallas as pl
from jax.experimental.pallas import tpu as pltpu


def _attn_reducer_seq_kernel(emb_ref,                    # (T, 1, I)  pre-gathered embedding rows (mm dtype)
                             h0_ref,                     # (1, H)     initial hidden state (f32)
                             e2_ref,                     # (1, L)     ||enc_l||^2 row (f32)
                             w_emb_ref, b_emb_ref,       # (I, H+L+I), (1, H+L+I)   [attn | dots | comb]
                             w_hid_ref, b_hid_ref,       # (H, 3H+H+L), (1, 3H+H+L) [gru_hh | attn | dots]
                             c_enc_ref,                  # (L, I)     enc @ comb_w_hid
                             w_ih_ref, b_ih_ref,         # (I, 3H), (1, 3H)   GRU input gates, order r|z|n
                             fc2_w_ref, fc2_b_ref,       # (H, 64), (1, 64)
                             out_w_ref, out_b_ref,       # (1, 64), (1, 1)
                             y_ref, h_out_ref, aw_ref):  # (T,1,1), (1,H per row), (T,1,L) VMEM-resident slabs
    f32 = jnp.float32
    T = emb_ref.shape[0]
    I = emb_ref.shape[-1]
    H = h_out_ref.shape[-1]
    L = aw_ref.shape[-1]
    mm = w_emb_ref.dtype                               # bf16 (MXU) or f32

    # Hoist all step-invariant VMEM loads out of the recurrence.
    w_emb = w_emb_ref[...]
    b_emb = b_emb_ref[...]
    w_hid = w_hid_ref[...]
    b_hid = b_hid_ref[...]
    c_enc = c_enc_ref[...]
    w_ih = w_ih_ref[...]
    b_ih = b_ih_ref[...]
    fc2_w = fc2_w_ref[...]
    fc2_b = fc2_b_ref[...]
    out_w = out_w_ref[...]
    out_b = out_b_ref[...]
    e2 = e2_ref[...]

    def step(t, hid):                                  # hid: (1, H) f32 carry
        emb = emb_ref[t]                               # (1, I) mm  (dropout == identity)

        # --- two independent MXU pushes at step start (latencies overlap) ---------------
        # emb-pack columns: [ attn(H) | dots(L) | comb(I) ]   (biases folded in)
        # hid-pack columns: [ gru_hh(3H) | attn(H) | dots(L) ]
        pe = jnp.dot(emb, w_emb, preferred_element_type=f32) + b_emb            # (1, H+L+I)
        ph = jnp.dot(hid.astype(mm), w_hid, preferred_element_type=f32) + b_hid  # (1, 3H+H+L)

        a = pe[:, 0:H] + ph[:, 3 * H:4 * H]            # attn Linear output      (1, H)
        dots = pe[:, H:H + L] + ph[:, 4 * H:4 * H + L]  # a @ enc^T (folded)      (1, L)
        comb_emb = pe[:, H + L:H + L + I]              # emb @ comb_w_emb + b    (1, I)
        gh = ph[:, 0:3 * H]                            # hid @ w_hh + b_hh       (1, 3H)

        # --- cosine similarity vs every encoder row (lane-dense (1, L)) ------------------
        a2 = jnp.sum(a * a, axis=-1, keepdims=True)                              # (1, 1)
        # min(rsqrt(|a|^2 |e|^2), 1e8) == 1 / max(|a|*|e|, 1e-8)  (PyTorch product clamp)
        inv_denom = jnp.minimum(lax.rsqrt(a2 * e2), 1e8)                         # (1, L)
        cos = dots * inv_denom

        # --- softmax over the lane (L) axis ----------------------------------------------
        mmax = jnp.max(cos, axis=-1, keepdims=True)
        ex = jnp.exp(cos - mmax)
        s = jnp.sum(ex, axis=-1, keepdims=True)
        w = ex * pl.reciprocal(s, approx=True)                                   # (1, L)
        aw_ref[t] = w                                  # VMEM-resident slab write

        # --- attn_combine + ReLU (attn_applied folded into C = enc @ comb_w_hid) ---------
        x = jnp.maximum(
            comb_emb + jnp.dot(w.astype(mm), c_enc, preferred_element_type=f32), 0.0)  # (1, I)

        # --- single-step GRU cell; input gates fused into one (1, 3H) matmul -------------
        gi = jnp.dot(x.astype(mm), w_ih, preferred_element_type=f32) + b_ih       # (1, 3H)
        r = jax.nn.sigmoid(gi[:, 0:H] + gh[:, 0:H])
        z = jax.nn.sigmoid(gi[:, H:2 * H] + gh[:, H:2 * H])
        n = jnp.tanh(gi[:, 2 * H:3 * H] + r * gh[:, 2 * H:3 * H])
        h_new = (1.0 - z) * n + z * hid                                            # (1, H)
        h_out_ref[t] = h_new

        # --- fc2 + ReLU, then the (64 -> 1) head as a VPU lane-dot ------------------------
        f = jnp.maximum(
            jnp.dot(h_new.astype(mm), fc2_w, preferred_element_type=f32) + fc2_b, 0.0)  # (1, 64)
        y = jnp.sum(f * out_w, axis=-1, keepdims=True) + out_b                    # (1, 1)
        y_ref[t] = y
        return h_new

    # Fully unroll for small T (LLO scheduler visibility); fall back to a rolled loop
    # if T ever grows large.
    lax.fori_loop(0, T, step, h0_ref[...], unroll=(T <= 16))


def _pack_params(params, encoder_outputs, matmul_dtype):
    """Fold the step-invariant encoder into the weights and pack emb-/hid-halves."""
    f32 = jnp.float32
    enc = encoder_outputs.astype(f32)                           # (L, H)
    attn_w = params["attn_w"].astype(f32)                       # (I+H, H)
    comb_w = params["comb_w"].astype(f32)                       # (I+H, I)
    I = comb_w.shape[1]
    H = attn_w.shape[1]
    L = enc.shape[0]

    attn_w_emb, attn_w_hid = attn_w[:I], attn_w[I:]             # (I,H), (H,H)
    comb_w_emb, comb_w_hid = comb_w[:I], comb_w[I:]             # (I,I), (H,I)
    enc_t = enc.T                                               # (H, L)

    wd_emb = attn_w_emb @ enc_t                                 # (I, L)
    wd_hid = attn_w_hid @ enc_t                                 # (H, L)
    b_dots = params["attn_b"].astype(f32) @ enc_t               # (1, L)
    c_enc = enc @ comb_w_hid                                    # (L, I)
    e2 = jnp.sum(enc * enc, axis=1)[None, :]                    # (1, L)

    # emb-pack columns: [ attn(H) | dots(L) | comb(I) ]  (all biases folded in)
    w_emb_pack = jnp.concatenate([attn_w_emb, wd_emb, comb_w_emb], axis=1)      # (I, H+L+I)
    b_emb_pack = jnp.concatenate([params["attn_b"].astype(f32), b_dots,
                                  params["comb_b"].astype(f32)], axis=1)        # (1, H+L+I)
    # hid-pack columns: [ gru_hh(3H) | attn(H) | dots(L) ]  (no slice crosses a 128-lane tile)
    w_hid_pack = jnp.concatenate([params["w_hh"].astype(f32), attn_w_hid, wd_hid],
                                 axis=1)                                         # (H, 3H+H+L)
    b_hid_pack = jnp.concatenate([params["b_hh"].astype(f32),
                                  jnp.zeros((1, H + L), f32)], axis=1)           # (1, 3H+H+L)

    cast = lambda x: x.astype(matmul_dtype)   # matmul weights only; biases stay f32
    return dict(
        e2=e2,
        w_emb_pack=cast(w_emb_pack), b_emb_pack=b_emb_pack,
        w_hid_pack=cast(w_hid_pack), b_hid_pack=b_hid_pack,
        c_enc=cast(c_enc),
        w_ih=cast(params["w_ih"].astype(f32)), b_ih=params["b_ih"].astype(f32),
        fc2_w=cast(params["fc2_w"].astype(f32)), fc2_b=params["fc2_b"].astype(f32),
        out_w=params["out_w"].astype(f32), out_b=params["out_b"].astype(f32),
    )


@partial(jax.jit, static_argnames=("matmul_dtype",))
def attn_reducer_run_sequence(tokens, hidden0, encoder_outputs, emb_table, params,
                              matmul_dtype=jnp.bfloat16):
    """Runs T 'identifier'/'keyword' decode steps in ONE un-gridded pallas_call.

    Semantically equivalent to calling AttnReducerRNN.forward once per token while
    carrying the hidden state, and stacking the per-step results.
    Returns (outputs (T,1,1), hiddens (T,1,1,H), attn_weights (T,1,L)).
    """
    tokens = jnp.asarray(tokens, dtype=jnp.int32)
    T = tokens.shape[0]
    vocab, I = emb_table.shape
    H = hidden0.shape[-1]
    L = encoder_outputs.shape[0]

    p = _pack_params(params, encoder_outputs, matmul_dtype)

    # Pre-gather embedding rows (clamped -> no OOB DMA risk); no per-step gather in-kernel.
    tok = jnp.clip(tokens, 0, vocab - 1)
    emb_rows = emb_table.astype(jnp.float32)[tok].reshape(T, 1, I).astype(matmul_dtype)
    h0 = hidden0.reshape(1, H).astype(jnp.float32)

    inputs = (emb_rows, h0, p["e2"],
              p["w_emb_pack"], p["b_emb_pack"],
              p["w_hid_pack"], p["b_hid_pack"],
              p["c_enc"], p["w_ih"], p["b_ih"],
              p["fc2_w"], p["fc2_b"], p["out_w"], p["out_b"])

    vmem = pl.BlockSpec(memory_space=pltpu.MemorySpace.VMEM)   # whole array, VMEM-resident
    out_shape = (jax.ShapeDtypeStruct((T, 1, 1), jnp.float32),
                 jax.ShapeDtypeStruct((T, 1, H), jnp.float32),
                 jax.ShapeDtypeStruct((T, 1, L), jnp.float32))

    # Total VMEM footprint here is well under 1 MiB on all generations; if T / L / H ever
    # grow, set pltpu.CompilerParams(vmem_limit_bytes=...) (v7x has only 64 MiB physical).
    # NOTE(v7x): batching independent sequences would add a leading "parallel" grid axis
    # to use the second TensorCore; the step recurrence itself must stay sequential.
    y_all, h_all, aw_all = pl.pallas_call(
        _attn_reducer_seq_kernel,
        out_shape=out_shape,
        in_specs=[vmem] * len(inputs),
        out_specs=(vmem, vmem, vmem),
    )(*inputs)

    return y_all, h_all.reshape(T, 1, 1, H), aw_all


def attn_reducer_forward(inp, hidden, encoder_outputs, emb_table, params,
                         matmul_dtype=jnp.bfloat16):
    """Single-step API mirroring AttnReducerRNN.forward ('identifier'/'keyword' branch)."""
    token, tag = inp
    if tag not in ("identifier", "keyword"):
        # TODO(synk): 'number' (float2bin_tensor) and 'string' (string2tensor + conv1d
        # stack) branches are host-side Python preprocessing; not implemented.
        raise NotImplementedError(f"tag '{tag}' not implemented")
    y, h, aw = attn_reducer_run_sequence(
        jnp.array([token], dtype=jnp.int32), hidden, encoder_outputs, emb_table, params,
        matmul_dtype=matmul_dtype)
    # match PyTorch return shapes: (1,1), (1,1,H), (1,L)
    return y[0], h[0], aw[0]


def _reference_run_sequence(tokens, hidden0, encoder_outputs, emb_table, params):
    """Pure-JAX f32 replica of the PyTorch forward (unfused), looped over tokens."""
    H = hidden0.shape[-1]
    L = encoder_outputs.shape[0]
    enc = encoder_outputs
    h = hidden0.reshape(1, H)
    ys, hs, aws = [], [], []
    for tok in np.asarray(tokens):
        emb = emb_table[int(tok)][None, :]                                   # dropout = identity
        cat = jnp.concatenate([emb, h], axis=1)
        a = cat @ params["attn_w"] + params["attn_b"]
        num = a @ enc.T
        den = jnp.maximum(jnp.linalg.norm(a, axis=1, keepdims=True)
                          * jnp.linalg.norm(enc, axis=1)[None, :], 1e-8)
        w = jax.nn.softmax(num / den, axis=1)
        attn_applied = w @ enc
        x = jax.nn.relu(jnp.concatenate([emb, attn_applied], axis=1)
                        @ params["comb_w"] + params["comb_b"])
        gi = x @ params["w_ih"] + params["b_ih"]
        gh = h @ params["w_hh"] + params["b_hh"]
        r = jax.nn.sigmoid(gi[:, :H] + gh[:, :H])
        z = jax.nn.sigmoid(gi[:, H:2 * H] + gh[:, H:2 * H])
        n = jnp.tanh(gi[:, 2 * H:] + r * gh[:, 2 * H:])
        h = (1.0 - z) * n + z * h
        f = jax.nn.relu(h @ params["fc2_w"] + params["fc2_b"])
        y = jnp.sum(f * params["out_w"], axis=1, keepdims=True) + params["out_b"]
        ys.append(y), hs.append(h), aws.append(w)
    T = len(ys)
    return (jnp.stack(ys).reshape(T, 1, 1),
            jnp.stack(hs).reshape(T, 1, 1, H),
            jnp.stack(aws).reshape(T, 1, L))


def init_params(key, I, H):
    """Random f32 params, stored as (in_features, out_features) = PyTorch weight.T."""
    keys = jax.random.split(key, 12)
    init = lambda k, s: jax.random.normal(k, s, jnp.float32) * 0.1
    return dict(
        attn_w=init(keys[0], (I + H, H)), attn_b=init(keys[1], (1, H)),
        comb_w=init(keys[2], (I + H, I)), comb_b=init(keys[3], (1, I)),
        w_ih=init(keys[4], (I, 3 * H)),   w_hh=init(keys[5], (H, 3 * H)),   # gate order r|z|n
        b_ih=init(keys[6], (1, 3 * H)),   b_hh=init(keys[7], (1, 3 * H)),
        fc2_w=init(keys[8], (H, 64)),     fc2_b=init(keys[9], (1, 64)),
        out_w=init(keys[10], (1, 64)),    out_b=init(keys[11], (1, 1)),
    )


if __name__ == "__main__":
    key = jax.random.PRNGKey(0)
    vocab = 50          # input_size (embedding rows)
    I = 32              # gru_input_size
    H = 32              # gru_hidden_size
    L = 8               # max_length (kept small)
    T = 6               # number of fused decode steps

    k_emb, k_par, k_enc = jax.random.split(key, 3)
    emb_table = jax.random.normal(k_emb, (vocab, I), jnp.float32) * 0.1
    params = init_params(k_par, I, H)
    encoder_outputs = jax.random.normal(k_enc, (L, H), jnp.float32) * 0.1
    hidden0 = jnp.zeros((1, 1, H), jnp.float32)               # initHidden()
    tokens = jnp.array([7, 3, 11, 0, 42, 19], dtype=jnp.int32)

    # --- f32 matmul path: validate against the pure-JAX reference of the torch forward ---
    ys, hs, aws = attn_reducer_run_sequence(tokens, hidden0, encoder_outputs, emb_table,
                                            params, matmul_dtype=jnp.float32)
    jax.block_until_ready((ys, hs, aws))
    ys_r, hs_r, aws_r = _reference_run_sequence(tokens, hidden0, encoder_outputs,
                                                emb_table, params)
    # Loose-ish tolerance: approx softmax reciprocal (EUP) + TPU matmul pass precision.
    np.testing.assert_allclose(np.asarray(ys), np.asarray(ys_r), rtol=2e-2, atol=2e-3)
    np.testing.assert_allclose(np.asarray(hs), np.asarray(hs_r), rtol=2e-2, atol=2e-3)
    np.testing.assert_allclose(np.asarray(aws), np.asarray(aws_r), rtol=2e-2, atol=2e-3)

    # --- bf16 matmul path (default, ~1e-2 rel error vs f32): shape/finiteness sanity -----
    ys_b, hs_b, aws_b = attn_reducer_run_sequence(tokens, hidden0, encoder_outputs,
                                                  emb_table, params)
    jax.block_until_ready((ys_b, hs_b, aws_b))
    assert ys_b.shape == (T, 1, 1) and hs_b.shape == (T, 1, 1, H) and aws_b.shape == (T, 1, L)
    assert bool(jnp.all(jnp.isfinite(ys_b))) and bool(jnp.all(jnp.isfinite(hs_b)))

    # --- single-step API parity with the torch module signature --------------------------
    y1, h1, aw1 = attn_reducer_forward((7, "identifier"), hidden0, encoder_outputs,
                                       emb_table, params)
    jax.block_until_ready((y1, h1, aw1))
    assert y1.shape == (1, 1) and h1.shape == (1, 1, H) and aw1.shape == (1, L)

    print("KERNEL_OK")
</pallas_src>

<mosaic_0001>
module attributes {stable_mosaic.version = 11 : i64} {
  func.func @_attn_reducer_seq_kernel(%arg0: memref<6x1x32xf32, #tpu.memory_space<vmem>>, %arg1: memref<1x32xf32, #tpu.memory_space<vmem>>, %arg2: memref<1x8xf32, #tpu.memory_space<vmem>>, %arg3: memref<32x72xf32, #tpu.memory_space<vmem>>, %arg4: memref<1x72xf32, #tpu.memory_space<vmem>>, %arg5: memref<32x136xf32, #tpu.memory_space<vmem>>, %arg6: memref<1x136xf32, #tpu.memory_space<vmem>>, %arg7: memref<8x32xf32, #tpu.memory_space<vmem>>, %arg8: memref<32x96xf32, #tpu.memory_space<vmem>>, %arg9: memref<1x96xf32, #tpu.memory_space<vmem>>, %arg10: memref<32x64xf32, #tpu.memory_space<vmem>>, %arg11: memref<1x64xf32, #tpu.memory_space<vmem>>, %arg12: memref<1x64xf32, #tpu.memory_space<vmem>>, %arg13: memref<1x1xf32, #tpu.memory_space<vmem>>, %arg14: memref<6x1x1xf32, #tpu.memory_space<vmem>>, %arg15: memref<6x1x32xf32, #tpu.memory_space<vmem>>, %arg16: memref<6x1x8xf32, #tpu.memory_space<vmem>>) attributes {dimension_semantics = [], scalar_prefetch = 0 : i64, scratch_operands = 0 : i64, tpu.core_type = #tpu.core_type<tc>} {
    %c0 = arith.constant 0 : index
    %c0_0 = arith.constant 0 : index
    %0 = vector.load %arg3[%c0, %c0_0] : memref<32x72xf32, #tpu.memory_space<vmem>>, vector<32x72xf32>
    %c0_1 = arith.constant 0 : index
    %c0_2 = arith.constant 0 : index
    %1 = vector.load %arg4[%c0_1, %c0_2] : memref<1x72xf32, #tpu.memory_space<vmem>>, vector<1x72xf32>
    %c0_3 = arith.constant 0 : index
    %c0_4 = arith.constant 0 : index
    %2 = vector.load %arg5[%c0_3, %c0_4] : memref<32x136xf32, #tpu.memory_space<vmem>>, vector<32x136xf32>
    %c0_5 = arith.constant 0 : index
    %c0_6 = arith.constant 0 : index
    %3 = vector.load %arg6[%c0_5, %c0_6] : memref<1x136xf32, #tpu.memory_space<vmem>>, vector<1x136xf32>
    %c0_7 = arith.constant 0 : index
    %c0_8 = arith.constant 0 : index
    %4 = vector.load %arg7[%c0_7, %c0_8] : memref<8x32xf32, #tpu.memory_space<vmem>>, vector<8x32xf32>
    %c0_9 = arith.constant 0 : index
    %c0_10 = arith.constant 0 : index
    %5 = vector.load %arg8[%c0_9, %c0_10] : memref<32x96xf32, #tpu.memory_space<vmem>>, vector<32x96xf32>
    %c0_11 = arith.constant 0 : index
    %c0_12 = arith.constant 0 : index
    %6 = vector.load %arg9[%c0_11, %c0_12] : memref<1x96xf32, #tpu.memory_space<vmem>>, vector<1x96xf32>
    %c0_13 = arith.constant 0 : index
    %c0_14 = arith.constant 0 : index
    %7 = vector.load %arg10[%c0_13, %c0_14] : memref<32x64xf32, #tpu.memory_space<vmem>>, vector<32x64xf32>
    %c0_15 = arith.constant 0 : index
    %c0_16 = arith.constant 0 : index
    %8 = vector.load %arg11[%c0_15, %c0_16] : memref<1x64xf32, #tpu.memory_space<vmem>>, vector<1x64xf32>
    %c0_17 = arith.constant 0 : index
    %c0_18 = arith.constant 0 : index
    %9 = vector.load %arg12[%c0_17, %c0_18] : memref<1x64xf32, #tpu.memory_space<vmem>>, vector<1x64xf32>
    %c0_19 = arith.constant 0 : index
    %c0_20 = arith.constant 0 : index
    %10 = vector.load %arg13[%c0_19, %c0_20] : memref<1x1xf32, #tpu.memory_space<vmem>>, vector<1x1xf32>
    %c0_21 = arith.constant 0 : index
    %c0_22 = arith.constant 0 : index
    %11 = vector.load %arg2[%c0_21, %c0_22] : memref<1x8xf32, #tpu.memory_space<vmem>>, vector<1x8xf32>
    %c0_23 = arith.constant 0 : index
    %c0_24 = arith.constant 0 : index
    %12 = vector.load %arg1[%c0_23, %c0_24] : memref<1x32xf32, #tpu.memory_space<vmem>>, vector<1x32xf32>
    %c0_i32 = arith.constant 0 : i32
    %13 = arith.index_cast %c0_i32 : i32 to index
    %c0_25 = arith.constant 0 : index
    %c0_26 = arith.constant 0 : index
    %14 = vector.load %arg0[%13, %c0_25, %c0_26] : memref<6x1x32xf32, #tpu.memory_space<vmem>>, vector<1x1x32xf32>
    %15 = vector.shape_cast %14 : vector<1x1x32xf32> to vector<1x32xf32>
    %cst = arith.constant dense<0.000000e+00> : vector<1x72xf32>
    %16 = tpu.matmul %15, %0, %cst {dimension_numbers = #tpu.dot_dimension_numbers<[1], [0], [0], [1], [0, 0, 1, 1], [], []>} : vector<1x32xf32>, vector<32x72xf32>, vector<1x72xf32> -> vector<1x72xf32>
    %17 = arith.addf %16, %1 : vector<1x72xf32>
    %cst_27 = arith.constant dense<0.000000e+00> : vector<1x136xf32>
    %18 = tpu.matmul %12, %2, %cst_27 {dimension_numbers = #tpu.dot_dimension_numbers<[1], [0], [0], [1], [0, 0, 1, 1], [], []>} : vector<1x32xf32>, vector<32x136xf32>, vector<1x136xf32> -> vector<1x136xf32>
    %19 = arith.addf %18, %3 : vector<1x136xf32>
    %20 = vector.extract_strided_slice %17 {offsets = [0, 0], sizes = [1, 32], strides = [1, 1]} : vector<1x72xf32> to vector<1x32xf32>
    %21 = vector.extract_strided_slice %19 {offsets = [0, 96], sizes = [1, 32], strides = [1, 1]} : vector<1x136xf32> to vector<1x32xf32>
    %22 = arith.addf %20, %21 : vector<1x32xf32>
    %23 = vector.extract_strided_slice %17 {offsets = [0, 32], sizes = [1, 8], strides = [1, 1]} : vector<1x72xf32> to vector<1x8xf32>
    %24 = vector.extract_strided_slice %19 {offsets = [0, 128], sizes = [1, 8], strides = [1, 1]} : vector<1x136xf32> to vector<1x8xf32>
    %25 = arith.addf %23, %24 : vector<1x8xf32>
    %26 = vector.extract_strided_slice %17 {offsets = [0, 40], sizes = [1, 32], strides = [1, 1]} : vector<1x72xf32> to vector<1x32xf32>
    %27 = vector.extract_strided_slice %19 {offsets = [0, 0], sizes = [1, 96], strides = [1, 1]} : vector<1x136xf32> to vector<1x96xf32>
    %28 = arith.mulf %22, %22 : vector<1x32xf32>
    %cst_28 = arith.constant dense<0.000000e+00> : vector<1xf32>
    %29 = vector.multi_reduction <add>, %28, %cst_28 [1] : vector<1x32xf32> to vector<1xf32>
    %30 = vector.shape_cast %29 : vector<1xf32> to vector<1x1xf32>
    %31 = vector.broadcast %30 : vector<1x1xf32> to vector<1x8xf32>
    %32 = arith.mulf %31, %11 : vector<1x8xf32>
    %33 = math.rsqrt %32 : vector<1x8xf32>
    %cst_29 = arith.constant 1.000000e+08 : f32
    %34 = vector.broadcast %cst_29 : f32 to vector<1x8xf32>
    %35 = arith.minimumf %33, %34 : vector<1x8xf32>
    %36 = arith.mulf %25, %35 : vector<1x8xf32>
    %cst_30 = arith.constant dense<0xFF800000> : vector<1xf32>
    %37 = vector.multi_reduction <maximumf>, %36, %cst_30 [1] : vector<1x8xf32> to vector<1xf32>
    %38 = vector.shape_cast %37 : vector<1xf32> to vector<1x1xf32>
    %39 = vector.broadcast %38 : vector<1x1xf32> to vector<1x8xf32>
    %40 = arith.subf %36, %39 : vector<1x8xf32>
    %41 = math.exp %40 : vector<1x8xf32>
    %cst_31 = arith.constant dense<0.000000e+00> : vector<1xf32>
    %42 = vector.multi_reduction <add>, %41, %cst_31 [1] : vector<1x8xf32> to vector<1xf32>
    %43 = vector.shape_cast %42 : vector<1xf32> to vector<1x1xf32>
    %44 = tpu.reciprocal %43 {approx = true} : vector<1x1xf32> -> vector<1x1xf32>
    %45 = vector.broadcast %44 : vector<1x1xf32> to vector<1x8xf32>
    %46 = arith.mulf %41, %45 : vector<1x8xf32>
    %47 = arith.index_cast %c0_i32 : i32 to index
    %c0_32 = arith.constant 0 : index
    %c0_33 = arith.constant 0 : index
    %48 = vector.load %arg16[%47, %c0_32, %c0_33] : memref<6x1x8xf32, #tpu.memory_space<vmem>>, vector<1x1x8xf32>
    %49 = vector.shape_cast %48 : vector<1x1x8xf32> to vector<1x8xf32>
    %50 = vector.shape_cast %46 : vector<1x8xf32> to vector<1x1x8xf32>
    tpu.vector_store %arg16[%47, %c0_32, %c0_33], %50 {strides = array<i32>} : memref<6x1x8xf32, #tpu.memory_space<vmem>>, vector<1x1x8xf32>,
    %cst_34 = arith.constant dense<0.000000e+00> : vector<1x32xf32>
    %51 = tpu.matmul %46, %4, %cst_34 {dimension_numbers = #tpu.dot_dimension_numbers<[1], [0], [0], [1], [0, 0, 1, 1], [], []>} : vector<1x8xf32>, vector<8x32xf32>, vector<1x32xf32> -> vector<1x32xf32>
    %52 = arith.addf %26, %51 : vector<1x32xf32>
    %cst_35 = arith.constant 0.000000e+00 : f32
    %53 = vector.broadcast %cst_35 : f32 to vector<1x32xf32>
    %54 = arith.maximumf %52, %53 : vector<1x32xf32>
    %cst_36 = arith.constant dense<0.000000e+00> : vector<1x96xf32>
    %55 = tpu.matmul %54, %5, %cst_36 {dimension_numbers = #tpu.dot_dimension_numbers<[1], [0], [0], [1], [0, 0, 1, 1], [], []>} : vector<1x32xf32>, vector<32x96xf32>, vector<1x96xf32> -> vector<1x96xf32>
    %56 = arith.addf %55, %6 : vector<1x96xf32>
    %57 = vector.extract_strided_slice %56 {offsets = [0, 0], sizes = [1, 32], strides = [1, 1]} : vector<1x96xf32> to vector<1x32xf32>
    %58 = vector.extract_strided_slice %27 {offsets = [0, 0], sizes = [1, 32], strides = [1, 1]} : vector<1x96xf32> to vector<1x32xf32>
    %59 = arith.addf %57, %58 : vector<1x32xf32>
    %60 = arith.negf %59 : vector<1x32xf32>
    %61 = math.exp %60 : vector<1x32xf32>
    %cst_37 = arith.constant 1.000000e+00 : f32
    %62 = vector.broadcast %cst_37 : f32 to vector<1x32xf32>
    %63 = arith.addf %62, %61 : vector<1x32xf32>
    %64 = arith.divf %62, %63 : vector<1x32xf32>
    %65 = vector.extract_strided_slice %56 {offsets = [0, 32], sizes = [1, 32], strides = [1, 1]} : vector<1x96xf32> to vector<1x32xf32>
    %66 = vector.extract_strided_slice %27 {offsets = [0, 32], sizes = [1, 32], strides = [1, 1]} : vector<1x96xf32> to vector<1x32xf32>
    %67 = arith.addf %65, %66 : vector<1x32xf32>
    %68 = arith.negf %67 : vector<1x32xf32>
    %69 = math.exp %68 : vector<1x32xf32>
    %cst_38 = arith.constant 1.000000e+00 : f32
    %70 = vector.broadcast %cst_38 : f32 to vector<1x32xf32>
    %71 = arith.addf %70, %69 : vector<1x32xf32>
    %72 = arith.divf %70, %71 : vector<1x32xf32>
    %73 = vector.extract_strided_slice %56 {offsets = [0, 64], sizes = [1, 32], strides = [1, 1]} : vector<1x96xf32> to vector<1x32xf32>
    %74 = vector.extract_strided_slice %27 {offsets = [0, 64], sizes = [1, 32], strides = [1, 1]} : vector<1x96xf32> to vector<1x32xf32>
    %75 = arith.mulf %64, %74 : vector<1x32xf32>
    %76 = arith.addf %73, %75 : vector<1x32xf32>
    %77 = math.tanh %76 : vector<1x32xf32>
    %cst_39 = arith.constant 1.000000e+00 : f32
    %78 = vector.broadcast %cst_39 : f32 to vector<1x32xf32>
    %79 = arith.subf %78, %72 : vector<1x32xf32>
    %80 = arith.mulf %79, %77 : vector<1x32xf32>
    %81 = arith.mulf %72, %12 : vector<1x32xf32>
    %82 = arith.addf %80, %81 : vector<1x32xf32>
    %83 = arith.index_cast %c0_i32 : i32 to index
    %c0_40 = arith.constant 0 : index
    %c0_41 = arith.constant 0 : index
    %84 = vector.load %arg15[%83, %c0_40, %c0_41] : memref<6x1x32xf32, #tpu.memory_space<vmem>>, vector<1x1x32xf32>
    %85 = vector.shape_cast %84 : vector<1x1x32xf32> to vector<1x32xf32>
    %86 = vector.shape_cast %82 : vector<1x32xf32> to vector<1x1x32xf32>
    tpu.vector_store %arg15[%83, %c0_40, %c0_41], %86 {strides = array<i32>} : memref<6x1x32xf32, #tpu.memory_space<vmem>>, vector<1x1x32xf32>,
    %cst_42 = arith.constant dense<0.000000e+00> : vector<1x64xf32>
    %87 = tpu.matmul %82, %7, %cst_42 {dimension_numbers = #tpu.dot_dimension_numbers<[1], [0], [0], [1], [0, 0, 1, 1], [], []>} : vector<1x32xf32>, vector<32x64xf32>, vector<1x64xf32> -> vector<1x64xf32>
    %88 = arith.addf %87, %8 : vector<1x64xf32>
    %cst_43 = arith.constant 0.000000e+00 : f32
    %89 = vector.broadcast %cst_43 : f32 to vector<1x64xf32>
    %90 = arith.maximumf %88, %89 : vector<1x64xf32>
    %91 = arith.mulf %90, %9 : vector<1x64xf32>
    %cst_44 = arith.constant dense<0.000000e+00> : vector<1xf32>
    %92 = vector.multi_reduction <add>, %91, %cst_44 [1] : vector<1x64xf32> to vector<1xf32>
    %93 = vector.shape_cast %92 : vector<1xf32> to vector<1x1xf32>
    %94 = arith.addf %93, %10 : vector<1x1xf32>
    %95 = arith.index_cast %c0_i32 : i32 to index
    %c0_45 = arith.constant 0 : index
    %c0_46 = arith.constant 0 : index
    %96 = vector.load %arg14[%95, %c0_45, %c0_46] : memref<6x1x1xf32, #tpu.memory_space<vmem>>, vector<1x1x1xf32>
    %97 = vector.shape_cast %96 : vector<1x1x1xf32> to vector<1x1xf32>
    %98 = vector.shape_cast %94 : vector<1x1xf32> to vector<1x1x1xf32>
    tpu.vector_store %arg14[%95, %c0_45, %c0_46], %98 {strides = array<i32>} : memref<6x1x1xf32, #tpu.memory_space<vmem>>, vector<1x1x1xf32>,
    %c1_i32 = arith.constant 1 : i32
    %99 = arith.index_cast %c1_i32 : i32 to index
    %c0_47 = arith.constant 0 : index
    %c0_48 = arith.constant 0 : index
    %100 = vector.load %arg0[%99, %c0_47, %c0_48] : memref<6x1x32xf32, #tpu.memory_space<vmem>>, vector<1x1x32xf32>
    %101 = vector.shape_cast %100 : vector<1x1x32xf32> to vector<1x32xf32>
    %cst_49 = arith.constant dense<0.000000e+00> : vector<1x72xf32>
    %102 = tpu.matmul %101, %0, %cst_49 {dimension_numbers = #tpu.dot_dimension_numbers<[1], [0], [0], [1], [0, 0, 1, 1], [], []>} : vector<1x32xf32>, vector<32x72xf32>, vector<1x72xf32> -> vector<1x72xf32>
    %103 = arith.addf %102, %1 : vector<1x72xf32>
    %cst_50 = arith.constant dense<0.000000e+00> : vector<1x136xf32>
    %104 = tpu.matmul %82, %2, %cst_50 {dimension_numbers = #tpu.dot_dimension_numbers<[1], [0], [0], [1], [0, 0, 1, 1], [], []>} : vector<1x32xf32>, vector<32x136xf32>, vector<1x136xf32> -> vector<1x136xf32>
    %105 = arith.addf %104, %3 : vector<1x136xf32>
    %106 = vector.extract_strided_slice %103 {offsets = [0, 0], sizes = [1, 32], strides = [1, 1]} : vector<1x72xf32> to vector<1x32xf32>
    %107 = vector.extract_strided_slice %105 {offsets = [0, 96], sizes = [1, 32], strides = [1, 1]} : vector<1x136xf32> to vector<1x32xf32>
    %108 = arith.addf %106, %107 : vector<1x32xf32>
    %109 = vector.extract_strided_slice %103 {offsets = [0, 32], sizes = [1, 8], strides = [1, 1]} : vector<1x72xf32> to vector<1x8xf32>
    %110 = vector.extract_strided_slice %105 {offsets = [0, 128], sizes = [1, 8], strides = [1, 1]} : vector<1x136xf32> to vector<1x8xf32>
    %111 = arith.addf %109, %110 : vector<1x8xf32>
    %112 = vector.extract_strided_slice %103 {offsets = [0, 40], sizes = [1, 32], strides = [1, 1]} : vector<1x72xf32> to vector<1x32xf32>
    %113 = vector.extract_strided_slice %105 {offsets = [0, 0], sizes = [1, 96], strides = [1, 1]} : vector<1x136xf32> to vector<1x96xf32>
    %114 = arith.mulf %108, %108 : vector<1x32xf32>
    %cst_51 = arith.constant dense<0.000000e+00> : vector<1xf32>
    %115 = vector.multi_reduction <add>, %114, %cst_51 [1] : vector<1x32xf32> to vector<1xf32>
    %116 = vector.shape_cast %115 : vector<1xf32> to vector<1x1xf32>
    %117 = vector.broadcast %116 : vector<1x1xf32> to vector<1x8xf32>
    %118 = arith.mulf %117, %11 : vector<1x8xf32>
    %119 = math.rsqrt %118 : vector<1x8xf32>
    %cst_52 = arith.constant 1.000000e+08 : f32
    %120 = vector.broadcast %cst_52 : f32 to vector<1x8xf32>
    %121 = arith.minimumf %119, %120 : vector<1x8xf32>
    %122 = arith.mulf %111, %121 : vector<1x8xf32>
    %cst_53 = arith.constant dense<0xFF800000> : vector<1xf32>
    %123 = vector.multi_reduction <maximumf>, %122, %cst_53 [1] : vector<1x8xf32> to vector<1xf32>
    %124 = vector.shape_cast %123 : vector<1xf32> to vector<1x1xf32>
    %125 = vector.broadcast %124 : vector<1x1xf32> to vector<1x8xf32>
    %126 = arith.subf %122, %125 : vector<1x8xf32>
    %127 = math.exp %126 : vector<1x8xf32>
    %cst_54 = arith.constant dense<0.000000e+00> : vector<1xf32>
    %128 = vector.multi_reduction <add>, %127, %cst_54 [1] : vector<1x8xf32> to vector<1xf32>
    %129 = vector.shape_cast %128 : vector<1xf32> to vector<1x1xf32>
    %130 = tpu.reciprocal %129 {approx = true} : vector<1x1xf32> -> vector<1x1xf32>
    %131 = vector.broadcast %130 : vector<1x1xf32> to vector<1x8xf32>
    %132 = arith.mulf %127, %131 : vector<1x8xf32>
    %133 = arith.index_cast %c1_i32 : i32 to index
    %c0_55 = arith.constant 0 : index
    %c0_56 = arith.constant 0 : index
    %134 = vector.load %arg16[%133, %c0_55, %c0_56] : memref<6x1x8xf32, #tpu.memory_space<vmem>>, vector<1x1x8xf32>
    %135 = vector.shape_cast %134 : vector<1x1x8xf32> to vector<1x8xf32>
    %136 = vector.shape_cast %132 : vector<1x8xf32> to vector<1x1x8xf32>
    tpu.vector_store %arg16[%133, %c0_55, %c0_56], %136 {strides = array<i32>} : memref<6x1x8xf32, #tpu.memory_space<vmem>>, vector<1x1x8xf32>,
    %cst_57 = arith.constant dense<0.000000e+00> : vector<1x32xf32>
    %137 = tpu.matmul %132, %4, %cst_57 {dimension_numbers = #tpu.dot_dimension_numbers<[1], [0], [0], [1], [0, 0, 1, 1], [], []>} : vector<1x8xf32>, vector<8x32xf32>, vector<1x32xf32> -> vector<1x32xf32>
    %138 = arith.addf %112, %137 : vector<1x32xf32>
    %cst_58 = arith.constant 0.000000e+00 : f32
    %139 = vector.broadcast %cst_58 : f32 to vector<1x32xf32>
    %140 = arith.maximumf %138, %139 : vector<1x32xf32>
    %cst_59 = arith.constant dense<0.000000e+00> : vector<1x96xf32>
    %141 = tpu.matmul %140, %5, %cst_59 {dimension_numbers = #tpu.dot_dimension_numbers<[1], [0], [0], [1], [0, 0, 1, 1], [], []>} : vector<1x32xf32>, vector<32x96xf32>, vector<1x96xf32> -> vector<1x96xf32>
    %142 = arith.addf %141, %6 : vector<1x96xf32>
    %143 = vector.extract_strided_slice %142 {offsets = [0, 0], sizes = [1, 32], strides = [1, 1]} : vector<1x96xf32> to vector<1x32xf32>
    %144 = vector.extract_strided_slice %113 {offsets = [0, 0], sizes = [1, 32], strides = [1, 1]} : vector<1x96xf32> to vector<1x32xf32>
    %145 = arith.addf %143, %144 : vector<1x32xf32>
    %146 = arith.negf %145 : vector<1x32xf32>
    %147 = math.exp %146 : vector<1x32xf32>
    %cst_60 = arith.constant 1.000000e+00 : f32
    %148 = vector.broadcast %cst_60 : f32 to vector<1x32xf32>
    %149 = arith.addf %148, %147 : vector<1x32xf32>
    %150 = arith.divf %148, %149 : vector<1x32xf32>
    %151 = vector.extract_strided_slice %142 {offsets = [0, 32], sizes = [1, 32], strides = [1, 1]} : vector<1x96xf32> to vector<1x32xf32>
    %152 = vector.extract_strided_slice %113 {offsets = [0, 32], sizes = [1, 32], strides = [1, 1]} : vector<1x96xf32> to vector<1x32xf32>
    %153 = arith.addf %151, %152 : vector<1x32xf32>
    %154 = arith.negf %153 : vector<1x32xf32>
    %155 = math.exp %154 : vector<1x32xf32>
    %cst_61 = arith.constant 1.000000e+00 : f32
    %156 = vector.broadcast %cst_61 : f32 to vector<1x32xf32>
    %157 = arith.addf %156, %155 : vector<1x32xf32>
    %158 = arith.divf %156, %157 : vector<1x32xf32>
    %159 = vector.extract_strided_slice %142 {offsets = [0, 64], sizes = [1, 32], strides = [1, 1]} : vector<1x96xf32> to vector<1x32xf32>
    %160 = vector.extract_strided_slice %113 {offsets = [0, 64], sizes = [1, 32], strides = [1, 1]} : vector<1x96xf32> to vector<1x32xf32>
    %161 = arith.mulf %150, %160 : vector<1x32xf32>
    %162 = arith.addf %159, %161 : vector<1x32xf32>
    %163 = math.tanh %162 : vector<1x32xf32>
    %cst_62 = arith.constant 1.000000e+00 : f32
    %164 = vector.broadcast %cst_62 : f32 to vector<1x32xf32>
    %165 = arith.subf %164, %158 : vector<1x32xf32>
    %166 = arith.mulf %165, %163 : vector<1x32xf32>
    %167 = arith.mulf %158, %82 : vector<1x32xf32>
    %168 = arith.addf %166, %167 : vector<1x32xf32>
    %169 = arith.index_cast %c1_i32 : i32 to index
    %c0_63 = arith.constant 0 : index
    %c0_64 = arith.constant 0 : index
    %170 = vector.load %arg15[%169, %c0_63, %c0_64] : memref<6x1x32xf32, #tpu.memory_space<vmem>>, vector<1x1x32xf32>
    %171 = vector.shape_cast %170 : vector<1x1x32xf32> to vector<1x32xf32>
    %172 = vector.shape_cast %168 : vector<1x32xf32> to vector<1x1x32xf32>
    tpu.vector_store %arg15[%169, %c0_63, %c0_64], %172 {strides = array<i32>} : memref<6x1x32xf32, #tpu.memory_space<vmem>>, vector<1x1x32xf32>,
    %cst_65 = arith.constant dense<0.000000e+00> : vector<1x64xf32>
    %173 = tpu.matmul %168, %7, %cst_65 {dimension_numbers = #tpu.dot_dimension_numbers<[1], [0], [0], [1], [0, 0, 1, 1], [], []>} : vector<1x32xf32>, vector<32x64xf32>, vector<1x64xf32> -> vector<1x64xf32>
    %174 = arith.addf %173, %8 : vector<1x64xf32>
    %cst_66 = arith.constant 0.000000e+00 : f32
    %175 = vector.broadcast %cst_66 : f32 to vector<1x64xf32>
    %176 = arith.maximumf %174, %175 : vector<1x64xf32>
    %177 = arith.mulf %176, %9 : vector<1x64xf32>
    %cst_67 = arith.constant dense<0.000000e+00> : vector<1xf32>
    %178 = vector.multi_reduction <add>, %177, %cst_67 [1] : vector<1x64xf32> to vector<1xf32>
    %179 = vector.shape_cast %178 : vector<1xf32> to vector<1x1xf32>
    %180 = arith.addf %179, %10 : vector<1x1xf32>
    %181 = arith.index_cast %c1_i32 : i32 to index
    %c0_68 = arith.constant 0 : index
    %c0_69 = arith.constant 0 : index
    %182 = vector.load %arg14[%181, %c0_68, %c0_69] : memref<6x1x1xf32, #tpu.memory_space<vmem>>, vector<1x1x1xf32>
    %183 = vector.shape_cast %182 : vector<1x1x1xf32> to vector<1x1xf32>
    %184 = vector.shape_cast %180 : vector<1x1xf32> to vector<1x1x1xf32>
    tpu.vector_store %arg14[%181, %c0_68, %c0_69], %184 {strides = array<i32>} : memref<6x1x1xf32, #tpu.memory_space<vmem>>, vector<1x1x1xf32>,
    %c2_i32 = arith.constant 2 : i32
    %185 = arith.index_cast %c2_i32 : i32 to index
    %c0_70 = arith.constant 0 : index
    %c0_71 = arith.constant 0 : index
    %186 = vector.load %arg0[%185, %c0_70, %c0_71] : memref<6x1x32xf32, #tpu.memory_space<vmem>>, vector<1x1x32xf32>
    %187 = vector.shape_cast %186 : vector<1x1x32xf32> to vector<1x32xf32>
    %cst_72 = arith.constant dense<0.000000e+00> : vector<1x72xf32>
    %188 = tpu.matmul %187, %0, %cst_72 {dimension_numbers = #tpu.dot_dimension_numbers<[1], [0], [0], [1], [0, 0, 1, 1], [], []>} : vector<1x32xf32>, vector<32x72xf32>, vector<1x72xf32> -> vector<1x72xf32>
    %189 = arith.addf %188, %1 : vector<1x72xf32>
    %cst_73 = arith.constant dense<0.000000e+00> : vector<1x136xf32>
    %190 = tpu.matmul %168, %2, %cst_73 {dimension_numbers = #tpu.dot_dimension_numbers<[1], [0], [0], [1], [0, 0, 1, 1], [], []>} : vector<1x32xf32>, vector<32x136xf32>, vector<1x136xf32> -> vector<1x136xf32>
    %191 = arith.addf %190, %3 : vector<1x136xf32>
    %192 = vector.extract_strided_slice %189 {offsets = [0, 0], sizes = [1, 32], strides = [1, 1]} : vector<1x72xf32> to vector<1x32xf32>
    %193 = vector.extract_strided_slice %191 {offsets = [0, 96], sizes = [1, 32], strides = [1, 1]} : vector<1x136xf32> to vector<1x32xf32>
    %194 = arith.addf %192, %193 : vector<1x32xf32>
    %195 = vector.extract_strided_slice %189 {offsets = [0, 32], sizes = [1, 8], strides = [1, 1]} : vector<1x72xf32> to vector<1x8xf32>
    %196 = vector.extract_strided_slice %191 {offsets = [0, 128], sizes = [1, 8], strides = [1, 1]} : vector<1x136xf32> to vector<1x8xf32>
    %197 = arith.addf %195, %196 : vector<1x8xf32>
    %198 = vector.extract_strided_slice %189 {offsets = [0, 40], sizes = [1, 32], strides = [1, 1]} : vector<1x72xf32> to vector<1x32xf32>
    %199 = vector.extract_strided_slice %191 {offsets = [0, 0], sizes = [1, 96], strides = [1, 1]} : vector<1x136xf32> to vector<1x96xf32>
    %200 = arith.mulf %194, %194 : vector<1x32xf32>
    %cst_74 = arith.constant dense<0.000000e+00> : vector<1xf32>
    %201 = vector.multi_reduction <add>, %200, %cst_74 [1] : vector<1x32xf32> to vector<1xf32>
    %202 = vector.shape_cast %201 : vector<1xf32> to vector<1x1xf32>
    %203 = vector.broadcast %202 : vector<1x1xf32> to vector<1x8xf32>
    %204 = arith.mulf %203, %11 : vector<1x8xf32>
    %205 = math.rsqrt %204 : vector<1x8xf32>
    %cst_75 = arith.constant 1.000000e+08 : f32
    %206 = vector.broadcast %cst_75 : f32 to vector<1x8xf32>
    %207 = arith.minimumf %205, %206 : vector<1x8xf32>
    %208 = arith.mulf %197, %207 : vector<1x8xf32>
    %cst_76 = arith.constant dense<0xFF800000> : vector<1xf32>
    %209 = vector.multi_reduction <maximumf>, %208, %cst_76 [1] : vector<1x8xf32> to vector<1xf32>
    %210 = vector.shape_cast %209 : vector<1xf32> to vector<1x1xf32>
    %211 = vector.broadcast %210 : vector<1x1xf32> to vector<1x8xf32>
    %212 = arith.subf %208, %211 : vector<1x8xf32>
    %213 = math.exp %212 : vector<1x8xf32>
    %cst_77 = arith.constant dense<0.000000e+00> : vector<1xf32>
    %214 = vector.multi_reduction <add>, %213, %cst_77 [1] : vector<1x8xf32> to vector<1xf32>
    %215 = vector.shape_cast %214 : vector<1xf32> to vector<1x1xf32>
    %216 = tpu.reciprocal %215 {approx = true} : vector<1x1xf32> -> vector<1x1xf32>
    %217 = vector.broadcast %216 : vector<1x1xf32> to vector<1x8xf32>
    %218 = arith.mulf %213, %217 : vector<1x8xf32>
    %219 = arith.index_cast %c2_i32 : i32 to index
    %c0_78 = arith.constant 0 : index
    %c0_79 = arith.constant 0 : index
    %220 = vector.load %arg16[%219, %c0_78, %c0_79] : memref<6x1x8xf32, #tpu.memory_space<vmem>>, vector<1x1x8xf32>
    %221 = vector.shape_cast %220 : vector<1x1x8xf32> to vector<1x8xf32>
    %222 = vector.shape_cast %218 : vector<1x8xf32> to vector<1x1x8xf32>
    tpu.vector_store %arg16[%219, %c0_78, %c0_79], %222 {strides = array<i32>} : memref<6x1x8xf32, #tpu.memory_space<vmem>>, vector<1x1x8xf32>,
    %cst_80 = arith.constant dense<0.000000e+00> : vector<1x32xf32>
    %223 = tpu.matmul %218, %4, %cst_80 {dimension_numbers = #tpu.dot_dimension_numbers<[1], [0], [0], [1], [0, 0, 1, 1], [], []>} : vector<1x8xf32>, vector<8x32xf32>, vector<1x32xf32> -> vector<1x32xf32>
    %224 = arith.addf %198, %223 : vector<1x32xf32>
    %cst_81 = arith.constant 0.000000e+00 : f32
    %225 = vector.broadcast %cst_81 : f32 to vector<1x32xf32>
    %226 = arith.maximumf %224, %225 : vector<1x32xf32>
    %cst_82 = arith.constant dense<0.000000e+00> : vector<1x96xf32>
    %227 = tpu.matmul %226, %5, %cst_82 {dimension_numbers = #tpu.dot_dimension_numbers<[1], [0], [0], [1], [0, 0, 1, 1], [], []>} : vector<1x32xf32>, vector<32x96xf32>, vector<1x96xf32> -> vector<1x96xf32>
    %228 = arith.addf %227, %6 : vector<1x96xf32>
    %229 = vector.extract_strided_slice %228 {offsets = [0, 0], sizes = [1, 32], strides = [1, 1]} : vector<1x96xf32> to vector<1x32xf32>
    %230 = vector.extract_strided_slice %199 {offsets = [0, 0], sizes = [1, 32], strides = [1, 1]} : vector<1x96xf32> to vector<1x32xf32>
    %231 = arith.addf %229, %230 : vector<1x32xf32>
    %232 = arith.negf %231 : vector<1x32xf32>
    %233 = math.exp %232 : vector<1x32xf32>
    %cst_83 = arith.constant 1.000000e+00 : f32
    %234 = vector.broadcast %cst_83 : f32 to vector<1x32xf32>
    %235 = arith.addf %234, %233 : vector<1x32xf32>
    %236 = arith.divf %234, %235 : vector<1x32xf32>
    %237 = vector.extract_strided_slice %228 {offsets = [0, 32], sizes = [1, 32], strides = [1, 1]} : vector<1x96xf32> to vector<1x32xf32>
    %238 = vector.extract_strided_slice %199 {offsets = [0, 32], sizes = [1, 32], strides = [1, 1]} : vector<1x96xf32> to vector<1x32xf32>
    %239 = arith.addf %237, %238 : vector<1x32xf32>
    %240 = arith.negf %239 : vector<1x32xf32>
    %241 = math.exp %240 : vector<1x32xf32>
    %cst_84 = arith.constant 1.000000e+00 : f32
    %242 = vector.broadcast %cst_84 : f32 to vector<1x32xf32>
    %243 = arith.addf %242, %241 : vector<1x32xf32>
    %244 = arith.divf %242, %243 : vector<1x32xf32>
    %245 = vector.extract_strided_slice %228 {offsets = [0, 64], sizes = [1, 32], strides = [1, 1]} : vector<1x96xf32> to vector<1x32xf32>
    %246 = vector.extract_strided_slice %199 {offsets = [0, 64], sizes = [1, 32], strides = [1, 1]} : vector<1x96xf32> to vector<1x32xf32>
    %247 = arith.mulf %236, %246 : vector<1x32xf32>
    %248 = arith.addf %245, %247 : vector<1x32xf32>
    %249 = math.tanh %248 : vector<1x32xf32>
    %cst_85 = arith.constant 1.000000e+00 : f32
    %250 = vector.broadcast %cst_85 : f32 to vector<1x32xf32>
    %251 = arith.subf %250, %244 : vector<1x32xf32>
    %252 = arith.mulf %251, %249 : vector<1x32xf32>
    %253 = arith.mulf %244, %168 : vector<1x32xf32>
    %254 = arith.addf %252, %253 : vector<1x32xf32>
    %255 = arith.index_cast %c2_i32 : i32 to index
    %c0_86 = arith.constant 0 : index
    %c0_87 = arith.constant 0 : index
    %256 = vector.load %arg15[%255, %c0_86, %c0_87] : memref<6x1x32xf32, #tpu.memory_space<vmem>>, vector<1x1x32xf32>
    %257 = vector.shape_cast %256 : vector<1x1x32xf32> to vector<1x32xf32>
    %258 = vector.shape_cast %254 : vector<1x32xf32> to vector<1x1x32xf32>
    tpu.vector_store %arg15[%255, %c0_86, %c0_87], %258 {strides = array<i32>} : memref<6x1x32xf32, #tpu.memory_space<vmem>>, vector<1x1x32xf32>,
    %cst_88 = arith.constant dense<0.000000e+00> : vector<1x64xf32>
    %259 = tpu.matmul %254, %7, %cst_88 {dimension_numbers = #tpu.dot_dimension_numbers<[1], [0], [0], [1], [0, 0, 1, 1], [], []>} : vector<1x32xf32>, vector<32x64xf32>, vector<1x64xf32> -> vector<1x64xf32>
    %260 = arith.addf %259, %8 : vector<1x64xf32>
    %cst_89 = arith.constant 0.000000e+00 : f32
    %261 = vector.broadcast %cst_89 : f32 to vector<1x64xf32>
    %262 = arith.maximumf %260, %261 : vector<1x64xf32>
    %263 = arith.mulf %262, %9 : vector<1x64xf32>
    %cst_90 = arith.constant dense<0.000000e+00> : vector<1xf32>
    %264 = vector.multi_reduction <add>, %263, %cst_90 [1] : vector<1x64xf32> to vector<1xf32>
    %265 = vector.shape_cast %264 : vector<1xf32> to vector<1x1xf32>
    %266 = arith.addf %265, %10 : vector<1x1xf32>
    %267 = arith.index_cast %c2_i32 : i32 to index
    %c0_91 = arith.constant 0 : index
    %c0_92 = arith.constant 0 : index
    %268 = vector.load %arg14[%267, %c0_91, %c0_92] : memref<6x1x1xf32, #tpu.memory_space<vmem>>, vector<1x1x1xf32>
    %269 = vector.shape_cast %268 : vector<1x1x1xf32> to vector<1x1xf32>
    %270 = vector.shape_cast %266 : vector<1x1xf32> to vector<1x1x1xf32>
    tpu.vector_store %arg14[%267, %c0_91, %c0_92], %270 {strides = array<i32>} : memref<6x1x1xf32, #tpu.memory_space<vmem>>, vector<1x1x1xf32>,
    %c3_i32 = arith.constant 3 : i32
    %271 = arith.index_cast %c3_i32 : i32 to index
    %c0_93 = arith.constant 0 : index
    %c0_94 = arith.constant 0 : index
    %272 = vector.load %arg0[%271, %c0_93, %c0_94] : memref<6x1x32xf32, #tpu.memory_space<vmem>>, vector<1x1x32xf32>
    %273 = vector.shape_cast %272 : vector<1x1x32xf32> to vector<1x32xf32>
    %cst_95 = arith.constant dense<0.000000e+00> : vector<1x72xf32>
    %274 = tpu.matmul %273, %0, %cst_95 {dimension_numbers = #tpu.dot_dimension_numbers<[1], [0], [0], [1], [0, 0, 1, 1], [], []>} : vector<1x32xf32>, vector<32x72xf32>, vector<1x72xf32> -> vector<1x72xf32>
    %275 = arith.addf %274, %1 : vector<1x72xf32>
    %cst_96 = arith.constant dense<0.000000e+00> : vector<1x136xf32>
    %276 = tpu.matmul %254, %2, %cst_96 {dimension_numbers = #tpu.dot_dimension_numbers<[1], [0], [0], [1], [0, 0, 1, 1], [], []>} : vector<1x32xf32>, vector<32x136xf32>, vector<1x136xf32> -> vector<1x136xf32>
    %277 = arith.addf %276, %3 : vector<1x136xf32>
    %278 = vector.extract_strided_slice %275 {offsets = [0, 0], sizes = [1, 32], strides = [1, 1]} : vector<1x72xf32> to vector<1x32xf32>
    %279 = vector.extract_strided_slice %277 {offsets = [0, 96], sizes = [1, 32], strides = [1, 1]} : vector<1x136xf32> to vector<1x32xf32>
    %280 = arith.addf %278, %279 : vector<1x32xf32>
    %281 = vector.extract_strided_slice %275 {offsets = [0, 32], sizes = [1, 8], strides = [1, 1]} : vector<1x72xf32> to vector<1x8xf32>
    %282 = vector.extract_strided_slice %277 {offsets = [0, 128], sizes = [1, 8], strides = [1, 1]} : vector<1x136xf32> to vector<1x8xf32>
    %283 = arith.addf %281, %282 : vector<1x8xf32>
    %284 = vector.extract_strided_slice %275 {offsets = [0, 40], sizes = [1, 32], strides = [1, 1]} : vector<1x72xf32> to vector<1x32xf32>
    %285 = vector.extract_strided_slice %277 {offsets = [0, 0], sizes = [1, 96], strides = [1, 1]} : vector<1x136xf32> to vector<1x96xf32>
    %286 = arith.mulf %280, %280 : vector<1x32xf32>
    %cst_97 = arith.constant dense<0.000000e+00> : vector<1xf32>
    %287 = vector.multi_reduction <add>, %286, %cst_97 [1] : vector<1x32xf32> to vector<1xf32>
    %288 = vector.shape_cast %287 : vector<1xf32> to vector<1x1xf32>
    %289 = vector.broadcast %288 : vector<1x1xf32> to vector<1x8xf32>
    %290 = arith.mulf %289, %11 : vector<1x8xf32>
    %291 = math.rsqrt %290 : vector<1x8xf32>
    %cst_98 = arith.constant 1.000000e+08 : f32
    %292 = vector.broadcast %cst_98 : f32 to vector<1x8xf32>
    %293 = arith.minimumf %291, %292 : vector<1x8xf32>
    %294 = arith.mulf %283, %293 : vector<1x8xf32>
    %cst_99 = arith.constant dense<0xFF800000> : vector<1xf32>
    %295 = vector.multi_reduction <maximumf>, %294, %cst_99 [1] : vector<1x8xf32> to vector<1xf32>
    %296 = vector.shape_cast %295 : vector<1xf32> to vector<1x1xf32>
    %297 = vector.broadcast %296 : vector<1x1xf32> to vector<1x8xf32>
    %298 = arith.subf %294, %297 : vector<1x8xf32>
    %299 = math.exp %298 : vector<1x8xf32>
    %cst_100 = arith.constant dense<0.000000e+00> : vector<1xf32>
    %300 = vector.multi_reduction <add>, %299, %cst_100 [1] : vector<1x8xf32> to vector<1xf32>
    %301 = vector.shape_cast %300 : vector<1xf32> to vector<1x1xf32>
    %302 = tpu.reciprocal %301 {approx = true} : vector<1x1xf32> -> vector<1x1xf32>
    %303 = vector.broadcast %302 : vector<1x1xf32> to vector<1x8xf32>
    %304 = arith.mulf %299, %303 : vector<1x8xf32>
    %305 = arith.index_cast %c3_i32 : i32 to index
    %c0_101 = arith.constant 0 : index
    %c0_102 = arith.constant 0 : index
    %306 = vector.load %arg16[%305, %c0_101, %c0_102] : memref<6x1x8xf32, #tpu.memory_space<vmem>>, vector<1x1x8xf32>
    %307 = vector.shape_cast %306 : vector<1x1x8xf32> to vector<1x8xf32>
    %308 = vector.shape_cast %304 : vector<1x8xf32> to vector<1x1x8xf32>
    tpu.vector_store %arg16[%305, %c0_101, %c0_102], %308 {strides = array<i32>} : memref<6x1x8xf32, #tpu.memory_space<vmem>>, vector<1x1x8xf32>,
    %cst_103 = arith.constant dense<0.000000e+00> : vector<1x32xf32>
    %309 = tpu.matmul %304, %4, %cst_103 {dimension_numbers = #tpu.dot_dimension_numbers<[1], [0], [0], [1], [0, 0, 1, 1], [], []>} : vector<1x8xf32>, vector<8x32xf32>, vector<1x32xf32> -> vector<1x32xf32>
    %310 = arith.addf %284, %309 : vector<1x32xf32>
    %cst_104 = arith.constant 0.000000e+00 : f32
    %311 = vector.broadcast %cst_104 : f32 to vector<1x32xf32>
    %312 = arith.maximumf %310, %311 : vector<1x32xf32>
    %cst_105 = arith.constant dense<0.000000e+00> : vector<1x96xf32>
    %313 = tpu.matmul %312, %5, %cst_105 {dimension_numbers = #tpu.dot_dimension_numbers<[1], [0], [0], [1], [0, 0, 1, 1], [], []>} : vector<1x32xf32>, vector<32x96xf32>, vector<1x96xf32> -> vector<1x96xf32>
    %314 = arith.addf %313, %6 : vector<1x96xf32>
    %315 = vector.extract_strided_slice %314 {offsets = [0, 0], sizes = [1, 32], strides = [1, 1]} : vector<1x96xf32> to vector<1x32xf32>
    %316 = vector.extract_strided_slice %285 {offsets = [0, 0], sizes = [1, 32], strides = [1, 1]} : vector<1x96xf32> to vector<1x32xf32>
    %317 = arith.addf %315, %316 : vector<1x32xf32>
    %318 = arith.negf %317 : vector<1x32xf32>
    %319 = math.exp %318 : vector<1x32xf32>
    %cst_106 = arith.constant 1.000000e+00 : f32
    %320 = vector.broadcast %cst_106 : f32 to vector<1x32xf32>
    %321 = arith.addf %320, %319 : vector<1x32xf32>
    %322 = arith.divf %320, %321 : vector<1x32xf32>
    %323 = vector.extract_strided_slice %314 {offsets = [0, 32], sizes = [1, 32], strides = [1, 1]} : vector<1x96xf32> to vector<1x32xf32>
    %324 = vector.extract_strided_slice %285 {offsets = [0, 32], sizes = [1, 32], strides = [1, 1]} : vector<1x96xf32> to vector<1x32xf32>
    %325 = arith.addf %323, %324 : vector<1x32xf32>
    %326 = arith.negf %325 : vector<1x32xf32>
    %327 = math.exp %326 : vector<1x32xf32>
    %cst_107 = arith.constant 1.000000e+00 : f32
    %328 = vector.broadcast %cst_107 : f32 to vector<1x32xf32>
    %329 = arith.addf %328, %327 : vector<1x32xf32>
    %330 = arith.divf %328, %329 : vector<1x32xf32>
    %331 = vector.extract_strided_slice %314 {offsets = [0, 64], sizes = [1, 32], strides = [1, 1]} : vector<1x96xf32> to vector<1x32xf32>
    %332 = vector.extract_strided_slice %285 {offsets = [0, 64], sizes = [1, 32], strides = [1, 1]} : vector<1x96xf32> to vector<1x32xf32>
    %333 = arith.mulf %322, %332 : vector<1x32xf32>
    %334 = arith.addf %331, %333 : vector<1x32xf32>
    %335 = math.tanh %334 : vector<1x32xf32>
    %cst_108 = arith.constant 1.000000e+00 : f32
    %336 = vector.broadcast %cst_108 : f32 to vector<1x32xf32>
    %337 = arith.subf %336, %330 : vector<1x32xf32>
    %338 = arith.mulf %337, %335 : vector<1x32xf32>
    %339 = arith.mulf %330, %254 : vector<1x32xf32>
    %340 = arith.addf %338, %339 : vector<1x32xf32>
    %341 = arith.index_cast %c3_i32 : i32 to index
    %c0_109 = arith.constant 0 : index
    %c0_110 = arith.constant 0 : index
    %342 = vector.load %arg15[%341, %c0_109, %c0_110] : memref<6x1x32xf32, #tpu.memory_space<vmem>>, vector<1x1x32xf32>
    %343 = vector.shape_cast %342 : vector<1x1x32xf32> to vector<1x32xf32>
    %344 = vector.shape_cast %340 : vector<1x32xf32> to vector<1x1x32xf32>
    tpu.vector_store %arg15[%341, %c0_109, %c0_110], %344 {strides = array<i32>} : memref<6x1x32xf32, #tpu.memory_space<vmem>>, vector<1x1x32xf32>,
    %cst_111 = arith.constant dense<0.000000e+00> : vector<1x64xf32>
    %345 = tpu.matmul %340, %7, %cst_111 {dimension_numbers = #tpu.dot_dimension_numbers<[1], [0], [0], [1], [0, 0, 1, 1], [], []>} : vector<1x32xf32>, vector<32x64xf32>, vector<1x64xf32> -> vector<1x64xf32>
    %346 = arith.addf %345, %8 : vector<1x64xf32>
    %cst_112 = arith.constant 0.000000e+00 : f32
    %347 = vector.broadcast %cst_112 : f32 to vector<1x64xf32>
    %348 = arith.maximumf %346, %347 : vector<1x64xf32>
    %349 = arith.mulf %348, %9 : vector<1x64xf32>
    %cst_113 = arith.constant dense<0.000000e+00> : vector<1xf32>
    %350 = vector.multi_reduction <add>, %349, %cst_113 [1] : vector<1x64xf32> to vector<1xf32>
    %351 = vector.shape_cast %350 : vector<1xf32> to vector<1x1xf32>
    %352 = arith.addf %351, %10 : vector<1x1xf32>
    %353 = arith.index_cast %c3_i32 : i32 to index
    %c0_114 = arith.constant 0 : index
    %c0_115 = arith.constant 0 : index
    %354 = vector.load %arg14[%353, %c0_114, %c0_115] : memref<6x1x1xf32, #tpu.memory_space<vmem>>, vector<1x1x1xf32>
    %355 = vector.shape_cast %354 : vector<1x1x1xf32> to vector<1x1xf32>
    %356 = vector.shape_cast %352 : vector<1x1xf32> to vector<1x1x1xf32>
    tpu.vector_store %arg14[%353, %c0_114, %c0_115], %356 {strides = array<i32>} : memref<6x1x1xf32, #tpu.memory_space<vmem>>, vector<1x1x1xf32>,
    %c4_i32 = arith.constant 4 : i32
    %357 = arith.index_cast %c4_i32 : i32 to index
    %c0_116 = arith.constant 0 : index
    %c0_117 = arith.constant 0 : index
    %358 = vector.load %arg0[%357, %c0_116, %c0_117] : memref<6x1x32xf32, #tpu.memory_space<vmem>>, vector<1x1x32xf32>
    %359 = vector.shape_cast %358 : vector<1x1x32xf32> to vector<1x32xf32>
    %cst_118 = arith.constant dense<0.000000e+00> : vector<1x72xf32>
    %360 = tpu.matmul %359, %0, %cst_118 {dimension_numbers = #tpu.dot_dimension_numbers<[1], [0], [0], [1], [0, 0, 1, 1], [], []>} : vector<1x32xf32>, vector<32x72xf32>, vector<1x72xf32> -> vector<1x72xf32>
    %361 = arith.addf %360, %1 : vector<1x72xf32>
    %cst_119 = arith.constant dense<0.000000e+00> : vector<1x136xf32>
    %362 = tpu.matmul %340, %2, %cst_119 {dimension_numbers = #tpu.dot_dimension_numbers<[1], [0], [0], [1], [0, 0, 1, 1], [], []>} : vector<1x32xf32>, vector<32x136xf32>, vector<1x136xf32> -> vector<1x136xf32>
    %363 = arith.addf %362, %3 : vector<1x136xf32>
    %364 = vector.extract_strided_slice %361 {offsets = [0, 0], sizes = [1, 32], strides = [1, 1]} : vector<1x72xf32> to vector<1x32xf32>
    %365 = vector.extract_strided_slice %363 {offsets = [0, 96], sizes = [1, 32], strides = [1, 1]} : vector<1x136xf32> to vector<1x32xf32>
    %366 = arith.addf %364, %365 : vector<1x32xf32>
    %367 = vector.extract_strided_slice %361 {offsets = [0, 32], sizes = [1, 8], strides = [1, 1]} : vector<1x72xf32> to vector<1x8xf32>
    %368 = vector.extract_strided_slice %363 {offsets = [0, 128], sizes = [1, 8], strides = [1, 1]} : vector<1x136xf32> to vector<1x8xf32>
    %369 = arith.addf %367, %368 : vector<1x8xf32>
    %370 = vector.extract_strided_slice %361 {offsets = [0, 40], sizes = [1, 32], strides = [1, 1]} : vector<1x72xf32> to vector<1x32xf32>
    %371 = vector.extract_strided_slice %363 {offsets = [0, 0], sizes = [1, 96], strides = [1, 1]} : vector<1x136xf32> to vector<1x96xf32>
    %372 = arith.mulf %366, %366 : vector<1x32xf32>
    %cst_120 = arith.constant dense<0.000000e+00> : vector<1xf32>
    %373 = vector.multi_reduction <add>, %372, %cst_120 [1] : vector<1x32xf32> to vector<1xf32>
    %374 = vector.shape_cast %373 : vector<1xf32> to vector<1x1xf32>
    %375 = vector.broadcast %374 : vector<1x1xf32> to vector<1x8xf32>
    %376 = arith.mulf %375, %11 : vector<1x8xf32>
    %377 = math.rsqrt %376 : vector<1x8xf32>
    %cst_121 = arith.constant 1.000000e+08 : f32
    %378 = vector.broadcast %cst_121 : f32 to vector<1x8xf32>
    %379 = arith.minimumf %377, %378 : vector<1x8xf32>
    %380 = arith.mulf %369, %379 : vector<1x8xf32>
    %cst_122 = arith.constant dense<0xFF800000> : vector<1xf32>
    %381 = vector.multi_reduction <maximumf>, %380, %cst_122 [1] : vector<1x8xf32> to vector<1xf32>
    %382 = vector.shape_cast %381 : vector<1xf32> to vector<1x1xf32>
    %383 = vector.broadcast %382 : vector<1x1xf32> to vector<1x8xf32>
    %384 = arith.subf %380, %383 : vector<1x8xf32>
    %385 = math.exp %384 : vector<1x8xf32>
    %cst_123 = arith.constant dense<0.000000e+00> : vector<1xf32>
    %386 = vector.multi_reduction <add>, %385, %cst_123 [1] : vector<1x8xf32> to vector<1xf32>
    %387 = vector.shape_cast %386 : vector<1xf32> to vector<1x1xf32>
    %388 = tpu.reciprocal %387 {approx = true} : vector<1x1xf32> -> vector<1x1xf32>
    %389 = vector.broadcast %388 : vector<1x1xf32> to vector<1x8xf32>
    %390 = arith.mulf %385, %389 : vector<1x8xf32>
    %391 = arith.index_cast %c4_i32 : i32 to index
    %c0_124 = arith.constant 0 : index
    %c0_125 = arith.constant 0 : index
    %392 = vector.load %arg16[%391, %c0_124, %c0_125] : memref<6x1x8xf32, #tpu.memory_space<vmem>>, vector<1x1x8xf32>
    %393 = vector.shape_cast %392 : vector<1x1x8xf32> to vector<1x8xf32>
    %394 = vector.shape_cast %390 : vector<1x8xf32> to vector<1x1x8xf32>
    tpu.vector_store %arg16[%391, %c0_124, %c0_125], %394 {strides = array<i32>} : memref<6x1x8xf32, #tpu.memory_space<vmem>>, vector<1x1x8xf32>,
    %cst_126 = arith.constant dense<0.000000e+00> : vector<1x32xf32>
    %395 = tpu.matmul %390, %4, %cst_126 {dimension_numbers = #tpu.dot_dimension_numbers<[1], [0], [0], [1], [0, 0, 1, 1], [], []>} : vector<1x8xf32>, vector<8x32xf32>, vector<1x32xf32> -> vector<1x32xf32>
    %396 = arith.addf %370, %395 : vector<1x32xf32>
    %cst_127 = arith.constant 0.000000e+00 : f32
    %397 = vector.broadcast %cst_127 : f32 to vector<1x32xf32>
    %398 = arith.maximumf %396, %397 : vector<1x32xf32>
    %cst_128 = arith.constant dense<0.000000e+00> : vector<1x96xf32>
    %399 = tpu.matmul %398, %5, %cst_128 {dimension_numbers = #tpu.dot_dimension_numbers<[1], [0], [0], [1], [0, 0, 1, 1], [], []>} : vector<1x32xf32>, vector<32x96xf32>, vector<1x96xf32> -> vector<1x96xf32>
    %400 = arith.addf %399, %6 : vector<1x96xf32>
    %401 = vector.extract_strided_slice %400 {offsets = [0, 0], sizes = [1, 32], strides = [1, 1]} : vector<1x96xf32> to vector<1x32xf32>
    %402 = vector.extract_strided_slice %371 {offsets = [0, 0], sizes = [1, 32], strides = [1, 1]} : vector<1x96xf32> to vector<1x32xf32>
    %403 = arith.addf %401, %402 : vector<1x32xf32>
    %404 = arith.negf %403 : vector<1x32xf32>
    %405 = math.exp %404 : vector<1x32xf32>
    %cst_129 = arith.constant 1.000000e+00 : f32
    %406 = vector.broadcast %cst_129 : f32 to vector<1x32xf32>
    %407 = arith.addf %406, %405 : vector<1x32xf32>
    %408 = arith.divf %406, %407 : vector<1x32xf32>
    %409 = vector.extract_strided_slice %400 {offsets = [0, 32], sizes = [1, 32], strides = [1, 1]} : vector<1x96xf32> to vector<1x32xf32>
    %410 = vector.extract_strided_slice %371 {offsets = [0, 32], sizes = [1, 32], strides = [1, 1]} : vector<1x96xf32> to vector<1x32xf32>
    %411 = arith.addf %409, %410 : vector<1x32xf32>
    %412 = arith.negf %411 : vector<1x32xf32>
    %413 = math.exp %412 : vector<1x32xf32>
    %cst_130 = arith.constant 1.000000e+00 : f32
    %414 = vector.broadcast %cst_130 : f32 to vector<1x32xf32>
    %415 = arith.addf %414, %413 : vector<1x32xf32>
    %416 = arith.divf %414, %415 : vector<1x32xf32>
    %417 = vector.extract_strided_slice %400 {offsets = [0, 64], sizes = [1, 32], strides = [1, 1]} : vector<1x96xf32> to vector<1x32xf32>
    %418 = vector.extract_strided_slice %371 {offsets = [0, 64], sizes = [1, 32], strides = [1, 1]} : vector<1x96xf32> to vector<1x32xf32>
    %419 = arith.mulf %408, %418 : vector<1x32xf32>
    %420 = arith.addf %417, %419 : vector<1x32xf32>
    %421 = math.tanh %420 : vector<1x32xf32>
    %cst_131 = arith.constant 1.000000e+00 : f32
    %422 = vector.broadcast %cst_131 : f32 to vector<1x32xf32>
    %423 = arith.subf %422, %416 : vector<1x32xf32>
    %424 = arith.mulf %423, %421 : vector<1x32xf32>
    %425 = arith.mulf %416, %340 : vector<1x32xf32>
    %426 = arith.addf %424, %425 : vector<1x32xf32>
    %427 = arith.index_cast %c4_i32 : i32 to index
    %c0_132 = arith.constant 0 : index
    %c0_133 = arith.constant 0 : index
    %428 = vector.load %arg15[%427, %c0_132, %c0_133] : memref<6x1x32xf32, #tpu.memory_space<vmem>>, vector<1x1x32xf32>
    %429 = vector.shape_cast %428 : vector<1x1x32xf32> to vector<1x32xf32>
    %430 = vector.shape_cast %426 : vector<1x32xf32> to vector<1x1x32xf32>
    tpu.vector_store %arg15[%427, %c0_132, %c0_133], %430 {strides = array<i32>} : memref<6x1x32xf32, #tpu.memory_space<vmem>>, vector<1x1x32xf32>,
    %cst_134 = arith.constant dense<0.000000e+00> : vector<1x64xf32>
    %431 = tpu.matmul %426, %7, %cst_134 {dimension_numbers = #tpu.dot_dimension_numbers<[1], [0], [0], [1], [0, 0, 1, 1], [], []>} : vector<1x32xf32>, vector<32x64xf32>, vector<1x64xf32> -> vector<1x64xf32>
    %432 = arith.addf %431, %8 : vector<1x64xf32>
    %cst_135 = arith.constant 0.000000e+00 : f32
    %433 = vector.broadcast %cst_135 : f32 to vector<1x64xf32>
    %434 = arith.maximumf %432, %433 : vector<1x64xf32>
    %435 = arith.mulf %434, %9 : vector<1x64xf32>
    %cst_136 = arith.constant dense<0.000000e+00> : vector<1xf32>
    %436 = vector.multi_reduction <add>, %435, %cst_136 [1] : vector<1x64xf32> to vector<1xf32>
    %437 = vector.shape_cast %436 : vector<1xf32> to vector<1x1xf32>
    %438 = arith.addf %437, %10 : vector<1x1xf32>
    %439 = arith.index_cast %c4_i32 : i32 to index
    %c0_137 = arith.constant 0 : index
    %c0_138 = arith.constant 0 : index
    %440 = vector.load %arg14[%439, %c0_137, %c0_138] : memref<6x1x1xf32, #tpu.memory_space<vmem>>, vector<1x1x1xf32>
    %441 = vector.shape_cast %440 : vector<1x1x1xf32> to vector<1x1xf32>
    %442 = vector.shape_cast %438 : vector<1x1xf32> to vector<1x1x1xf32>
    tpu.vector_store %arg14[%439, %c0_137, %c0_138], %442 {strides = array<i32>} : memref<6x1x1xf32, #tpu.memory_space<vmem>>, vector<1x1x1xf32>,
    %c5_i32 = arith.constant 5 : i32
    %443 = arith.index_cast %c5_i32 : i32 to index
    %c0_139 = arith.constant 0 : index
    %c0_140 = arith.constant 0 : index
    %444 = vector.load %arg0[%443, %c0_139, %c0_140] : memref<6x1x32xf32, #tpu.memory_space<vmem>>, vector<1x1x32xf32>
    %445 = vector.shape_cast %444 : vector<1x1x32xf32> to vector<1x32xf32>
    %cst_141 = arith.constant dense<0.000000e+00> : vector<1x72xf32>
    %446 = tpu.matmul %445, %0, %cst_141 {dimension_numbers = #tpu.dot_dimension_numbers<[1], [0], [0], [1], [0, 0, 1, 1], [], []>} : vector<1x32xf32>, vector<32x72xf32>, vector<1x72xf32> -> vector<1x72xf32>
    %447 = arith.addf %446, %1 : vector<1x72xf32>
    %cst_142 = arith.constant dense<0.000000e+00> : vector<1x136xf32>
    %448 = tpu.matmul %426, %2, %cst_142 {dimension_numbers = #tpu.dot_dimension_numbers<[1], [0], [0], [1], [0, 0, 1, 1], [], []>} : vector<1x32xf32>, vector<32x136xf32>, vector<1x136xf32> -> vector<1x136xf32>
    %449 = arith.addf %448, %3 : vector<1x136xf32>
    %450 = vector.extract_strided_slice %447 {offsets = [0, 0], sizes = [1, 32], strides = [1, 1]} : vector<1x72xf32> to vector<1x32xf32>
    %451 = vector.extract_strided_slice %449 {offsets = [0, 96], sizes = [1, 32], strides = [1, 1]} : vector<1x136xf32> to vector<1x32xf32>
    %452 = arith.addf %450, %451 : vector<1x32xf32>
    %453 = vector.extract_strided_slice %447 {offsets = [0, 32], sizes = [1, 8], strides = [1, 1]} : vector<1x72xf32> to vector<1x8xf32>
    %454 = vector.extract_strided_slice %449 {offsets = [0, 128], sizes = [1, 8], strides = [1, 1]} : vector<1x136xf32> to vector<1x8xf32>
    %455 = arith.addf %453, %454 : vector<1x8xf32>
    %456 = vector.extract_strided_slice %447 {offsets = [0, 40], sizes = [1, 32], strides = [1, 1]} : vector<1x72xf32> to vector<1x32xf32>
    %457 = vector.extract_strided_slice %449 {offsets = [0, 0], sizes = [1, 96], strides = [1, 1]} : vector<1x136xf32> to vector<1x96xf32>
    %458 = arith.mulf %452, %452 : vector<1x32xf32>
    %cst_143 = arith.constant dense<0.000000e+00> : vector<1xf32>
    %459 = vector.multi_reduction <add>, %458, %cst_143 [1] : vector<1x32xf32> to vector<1xf32>
    %460 = vector.shape_cast %459 : vector<1xf32> to vector<1x1xf32>
    %461 = vector.broadcast %460 : vector<1x1xf32> to vector<1x8xf32>
    %462 = arith.mulf %461, %11 : vector<1x8xf32>
    %463 = math.rsqrt %462 : vector<1x8xf32>
    %cst_144 = arith.constant 1.000000e+08 : f32
    %464 = vector.broadcast %cst_144 : f32 to vector<1x8xf32>
    %465 = arith.minimumf %463, %464 : vector<1x8xf32>
    %466 = arith.mulf %455, %465 : vector<1x8xf32>
    %cst_145 = arith.constant dense<0xFF800000> : vector<1xf32>
    %467 = vector.multi_reduction <maximumf>, %466, %cst_145 [1] : vector<1x8xf32> to vector<1xf32>
    %468 = vector.shape_cast %467 : vector<1xf32> to vector<1x1xf32>
    %469 = vector.broadcast %468 : vector<1x1xf32> to vector<1x8xf32>
    %470 = arith.subf %466, %469 : vector<1x8xf32>
    %471 = math.exp %470 : vector<1x8xf32>
    %cst_146 = arith.constant dense<0.000000e+00> : vector<1xf32>
    %472 = vector.multi_reduction <add>, %471, %cst_146 [1] : vector<1x8xf32> to vector<1xf32>
    %473 = vector.shape_cast %472 : vector<1xf32> to vector<1x1xf32>
    %474 = tpu.reciprocal %473 {approx = true} : vector<1x1xf32> -> vector<1x1xf32>
    %475 = vector.broadcast %474 : vector<1x1xf32> to vector<1x8xf32>
    %476 = arith.mulf %471, %475 : vector<1x8xf32>
    %477 = arith.index_cast %c5_i32 : i32 to index
    %c0_147 = arith.constant 0 : index
    %c0_148 = arith.constant 0 : index
    %478 = vector.load %arg16[%477, %c0_147, %c0_148] : memref<6x1x8xf32, #tpu.memory_space<vmem>>, vector<1x1x8xf32>
    %479 = vector.shape_cast %478 : vector<1x1x8xf32> to vector<1x8xf32>
    %480 = vector.shape_cast %476 : vector<1x8xf32> to vector<1x1x8xf32>
    tpu.vector_store %arg16[%477, %c0_147, %c0_148], %480 {strides = array<i32>} : memref<6x1x8xf32, #tpu.memory_space<vmem>>, vector<1x1x8xf32>,
    %cst_149 = arith.constant dense<0.000000e+00> : vector<1x32xf32>
    %481 = tpu.matmul %476, %4, %cst_149 {dimension_numbers = #tpu.dot_dimension_numbers<[1], [0], [0], [1], [0, 0, 1, 1], [], []>} : vector<1x8xf32>, vector<8x32xf32>, vector<1x32xf32> -> vector<1x32xf32>
    %482 = arith.addf %456, %481 : vector<1x32xf32>
    %cst_150 = arith.constant 0.000000e+00 : f32
    %483 = vector.broadcast %cst_150 : f32 to vector<1x32xf32>
    %484 = arith.maximumf %482, %483 : vector<1x32xf32>
    %cst_151 = arith.constant dense<0.000000e+00> : vector<1x96xf32>
    %485 = tpu.matmul %484, %5, %cst_151 {dimension_numbers = #tpu.dot_dimension_numbers<[1], [0], [0], [1], [0, 0, 1, 1], [], []>} : vector<1x32xf32>, vector<32x96xf32>, vector<1x96xf32> -> vector<1x96xf32>
    %486 = arith.addf %485, %6 : vector<1x96xf32>
    %487 = vector.extract_strided_slice %486 {offsets = [0, 0], sizes = [1, 32], strides = [1, 1]} : vector<1x96xf32> to vector<1x32xf32>
    %488 = vector.extract_strided_slice %457 {offsets = [0, 0], sizes = [1, 32], strides = [1, 1]} : vector<1x96xf32> to vector<1x32xf32>
    %489 = arith.addf %487, %488 : vector<1x32xf32>
    %490 = arith.negf %489 : vector<1x32xf32>
    %491 = math.exp %490 : vector<1x32xf32>
    %cst_152 = arith.constant 1.000000e+00 : f32
    %492 = vector.broadcast %cst_152 : f32 to vector<1x32xf32>
    %493 = arith.addf %492, %491 : vector<1x32xf32>
    %494 = arith.divf %492, %493 : vector<1x32xf32>
    %495 = vector.extract_strided_slice %486 {offsets = [0, 32], sizes = [1, 32], strides = [1, 1]} : vector<1x96xf32> to vector<1x32xf32>
    %496 = vector.extract_strided_slice %457 {offsets = [0, 32], sizes = [1, 32], strides = [1, 1]} : vector<1x96xf32> to vector<1x32xf32>
    %497 = arith.addf %495, %496 : vector<1x32xf32>
    %498 = arith.negf %497 : vector<1x32xf32>
    %499 = math.exp %498 : vector<1x32xf32>
    %cst_153 = arith.constant 1.000000e+00 : f32
    %500 = vector.broadcast %cst_153 : f32 to vector<1x32xf32>
    %501 = arith.addf %500, %499 : vector<1x32xf32>
    %502 = arith.divf %500, %501 : vector<1x32xf32>
    %503 = vector.extract_strided_slice %486 {offsets = [0, 64], sizes = [1, 32], strides = [1, 1]} : vector<1x96xf32> to vector<1x32xf32>
    %504 = vector.extract_strided_slice %457 {offsets = [0, 64], sizes = [1, 32], strides = [1, 1]} : vector<1x96xf32> to vector<1x32xf32>
    %505 = arith.mulf %494, %504 : vector<1x32xf32>
    %506 = arith.addf %503, %505 : vector<1x32xf32>
    %507 = math.tanh %506 : vector<1x32xf32>
    %cst_154 = arith.constant 1.000000e+00 : f32
    %508 = vector.broadcast %cst_154 : f32 to vector<1x32xf32>
    %509 = arith.subf %508, %502 : vector<1x32xf32>
    %510 = arith.mulf %509, %507 : vector<1x32xf32>
    %511 = arith.mulf %502, %426 : vector<1x32xf32>
    %512 = arith.addf %510, %511 : vector<1x32xf32>
    %513 = arith.index_cast %c5_i32 : i32 to index
    %c0_155 = arith.constant 0 : index
    %c0_156 = arith.constant 0 : index
    %514 = vector.load %arg15[%513, %c0_155, %c0_156] : memref<6x1x32xf32, #tpu.memory_space<vmem>>, vector<1x1x32xf32>
    %515 = vector.shape_cast %514 : vector<1x1x32xf32> to vector<1x32xf32>
    %516 = vector.shape_cast %512 : vector<1x32xf32> to vector<1x1x32xf32>
    tpu.vector_store %arg15[%513, %c0_155, %c0_156], %516 {strides = array<i32>} : memref<6x1x32xf32, #tpu.memory_space<vmem>>, vector<1x1x32xf32>,
    %cst_157 = arith.constant dense<0.000000e+00> : vector<1x64xf32>
    %517 = tpu.matmul %512, %7, %cst_157 {dimension_numbers = #tpu.dot_dimension_numbers<[1], [0], [0], [1], [0, 0, 1, 1], [], []>} : vector<1x32xf32>, vector<32x64xf32>, vector<1x64xf32> -> vector<1x64xf32>
    %518 = arith.addf %517, %8 : vector<1x64xf32>
    %cst_158 = arith.constant 0.000000e+00 : f32
    %519 = vector.broadcast %cst_158 : f32 to vector<1x64xf32>
    %520 = arith.maximumf %518, %519 : vector<1x64xf32>
    %521 = arith.mulf %520, %9 : vector<1x64xf32>
    %cst_159 = arith.constant dense<0.000000e+00> : vector<1xf32>
    %522 = vector.multi_reduction <add>, %521, %cst_159 [1] : vector<1x64xf32> to vector<1xf32>
    %523 = vector.shape_cast %522 : vector<1xf32> to vector<1x1xf32>
    %524 = arith.addf %523, %10 : vector<1x1xf32>
    %525 = arith.index_cast %c5_i32 : i32 to index
    %c0_160 = arith.constant 0 : index
    %c0_161 = arith.constant 0 : index
    %526 = vector.load %arg14[%525, %c0_160, %c0_161] : memref<6x1x1xf32, #tpu.memory_space<vmem>>, vector<1x1x1xf32>
    %527 = vector.shape_cast %526 : vector<1x1x1xf32> to vector<1x1xf32>
    %528 = vector.shape_cast %524 : vector<1x1xf32> to vector<1x1x1xf32>
    tpu.vector_store %arg14[%525, %c0_160, %c0_161], %528 {strides = array<i32>} : memref<6x1x1xf32, #tpu.memory_space<vmem>>, vector<1x1x1xf32>,
    %c6_i32 = arith.constant 6 : i32
    return
  }
}

</mosaic_0001>

<bundles_post_ra>
// kernel: attn_reducer_run_sequence.1
= control target key start
LH: loop header
LB: loop body
LE: loop exit
PB: predicated region body
PF: predicated region fallthrough
CT: control target
= control target key end

     0   :  { %s4220_s0 = inlined_call_operand.vmem [shape: f32[6,1,32], index: 0, kind: input, shape index: {}]   ;;  %s4221_s1 = inlined_call_operand.vmem [shape: f32[1,32], index: 1, kind: input, shape index: {}]   ;;  %s4222_s2 = inlined_call_operand.vmem [shape: f32[1,8], index: 2, kind: input, shape index: {}]   ;;  %s4223_s3 = inlined_call_operand.vmem [shape: f32[32,72], index: 3, kind: input, shape index: {}]   ;;  %s4224_s4 = inlined_call_operand.vmem [shape: f32[1,72], index: 4, kind: input, shape index: {}]   ;;  %s4225_s5 = inlined_call_operand.vmem [shape: f32[32,136], index: 5, kind: input, shape index: {}]   ;;  %s4226_s6 = inlined_call_operand.vmem [shape: f32[1,136], index: 6, kind: input, shape index: {}]   ;;  %s4227_s7 = inlined_call_operand.vmem [shape: f32[8,32], index: 7, kind: input, shape index: {}]   ;;  %s4228_s8 = inlined_call_operand.vmem [shape: f32[32,96], index: 8, kind: input, shape index: {}]   ;;  %s4229_s9 = inlined_call_operand.vmem [shape: f32[1,96], index: 9, kind: input, shape index: {}]   ;;  %s4230_s10 = inlined_call_operand.vmem [shape: f32[32,64], index: 10, kind: input, shape index: {}]   ;;  %s4231_s11 = inlined_call_operand.vmem [shape: f32[1,64], index: 11, kind: input, shape index: {}]   ;;  %s4232_s12 = inlined_call_operand.vmem [shape: f32[1,64], index: 12, kind: input, shape index: {}]   ;;  %s4233_s13 = inlined_call_operand.<no memory space> [shape: f32[1,1], index: 13, kind: input, shape index: {}]   ;;  %s4234_s14 = inlined_call_operand.vmem [shape: f32[6,1,1], index: 14, kind: output, shape index: {0}]   ;;  %s4235_s15 = inlined_call_operand.hbm [shape: f32[6,1,32], index: 15, kind: output, shape index: {1}]   ;;  %s4236_s16 = inlined_call_operand.hbm [shape: f32[6,1,8], index: 16, kind: output, shape index: {2}]  }
   0x1   :  { %4238 = sst [smem:[#allocation9_spill]] %s4220_s0  ;;  %v22_v0 = vstv %s4233_s13 }
   0x2   :  { %23 = vst [vmem:[#allocation2] sm:$0x1] %v22_v0 }
   0x3   :  { %24 = vsyncpa [#allocation4], 0  ;;  %v60_v1 = vld [vmem:[%s4225_s5 + $0x8] sm:$0xff]  ;;  %v62_v2 = vld [vmem:[%s4225_s5 + $0x18] sm:$0xff]  ;;  %v3528_v8 = vmov 0.0   ;;  %v3529_v9 = vmov 0.0|0.0  }
   0x4   :  { %v59_v3 = vld [vmem:[%s4225_s5] sm:$0xff]  ;;  %v3637_v4 = vpack.c.bf16 %v62_v2, %v60_v1  ;;  %v61_v5 = vld [vmem:[%s4225_s5 + $0x10] sm:$0xff]  ;;  %v64_v6 = vld [vmem:[%s4225_s5 + $0x28] sm:$0xff]  ;;  %236 = vmatprep.mubr.f32.mxu1 %v3528_v8  ;;  %3237 = vmatprep.subr.bf16.mxu0 %v3529_v9  ;;  %vm3530_vm0 = vmmov 0  }
   0x5   :  { %v66_v7 = vld [vmem:[%s4225_s5 + $0x38] sm:$0xff]  ;;  %v3650_v10 = vpack.c.bf16 %v61_v5, %v59_v3  ;;  %v63_v12 = vld [vmem:[%s4225_s5 + $0x20] sm:$0xff]  ;;  %v65_v13 = vld [vmem:[%s4225_s5 + $0x30] sm:$0xff]  ;;  %3017 = vmatprep.mubr.msk.f32.mxu0 %vm3530_vm0, %v3528_v8 }
   0x6   :  { %v3652_v11 = vpack.c.bf16 %v66_v7, %v64_v6  ;;  %3244 = vmatprep.subr.bf16.mxu1 %v3637_v4  ;;  %v54_v14 = vld [vmem:[%s4223_s3] sm:$0xff]  ;;  %v55_v15 = vld [vmem:[%s4223_s3 + $0x8] sm:$0xff]  ;;  %v56_v16 = vld [vmem:[%s4223_s3 + $0x10] sm:$0xff]  ;;  %v3673_v17 = vpack.c.bf16 %v65_v13, %v63_v12 }
   0x7   :  { %3246 = vmatpush1.bf16.msra.mxu1 %v3650_v10  ;;  %v3675_v18 = vpack.c.bf16 %v55_v15, %v54_v14  ;;  %v57_v19 = vld [vmem:[%s4223_s3 + $0x18] sm:$0xff] }
   0x8   :  { %3248 = vmatprep.subr.bf16.mxu1 %v3652_v11 }
   0x9   :  { %25 = vsyncpa [#allocation6], 0  ;;  %3239 = vmatpush3.bf16.msra.mxu0 %v3675_v18  ;;  %v3682_v20 = vpack.c.bf16 %v57_v19, %v56_v16  ;;  %v3689_v21 = vld [vmem:[%s4221_s1] sm:$0x1]  ;;  %vm84_vm1 = vcmask 261120   ;;  %s4239_s17 = sld [smem:[#allocation9_spill]]  ;;  %v159_v23 = vlaneseq }
   0xa   :  { %3240 = vmatprep.subr.bf16.mxu0 %v3529_v9  ;;  %v67_v26 = vld [vmem:[%s4226_s6] sm:$0x3]  ;;  %s3531_s19 = smov 32   ;;  %vm254_vm2 = vcmask 253952   ;;  %vm266_vm3 = vcmask 319744   ;;  %s3532_s23 = smov 96  }
   0xb   :  { %3250 = vmatpush1.bf16.msra.mxu1 %v3673_v17  ;;  %v3704_v24 = vshrl.u32 %v159_v23, 7  ;;  %v3727_v36 = vld [vmem:[%s4224_s4] sm:$0x1]  ;;  %vm277_vm4 = vcmask 57344   ;;  %vm288_vm5 = vcmask 64512   ;;  %v70_v0 = vld [vmem:[%s4228_s8 + $0x8] sm:$0xff] }
   0xc   :  { %3251 = vmatprep.subr.bf16.mxu1 %v3529_v9  ;;  %v3734_v42 = vld [vmem:[%s4222_s2] sm:$0x1]  ;;  %v71_v1 = vld [vmem:[%s4228_s8 + $0x10] sm:$0xff]  ;;  %v72_v3 = vld [vmem:[%s4228_s8 + $0x18] sm:$0xff]  ;;  %s3533_s3 = smov 40   ;;  %s3534_s0 = smov 88  }
   0xd   :  { %3242 = vmatpush3.bf16.msra.mxu0 %v3682_v20  ;;  %v161_v25 = vsub.s32 0, %v3704_v24  ;;  %v165_v27 = vsub.s32 1, %v3704_v24  ;;  %v3744_v58 = vld [vmem:[%s4227_s7] sm:$0xff]  ;;  %v3768_v5 = vpack.c.bf16 %v72_v3, %v71_v1  ;;  %vm553_vm6 = vcmask 516096   ;;  %s3537_s29 = smov [#allocation5]  }
   0xe   :  { %2862 = vmatmul.mubr.msk.f32.vlgmr.msra.gmra.mrb[0].mxu1 %vm84_vm1, %v3689_v21  ;;  %3020 = vmatprep.subr.mxu0 %v3528_v8  ;;  %v69_v63 = vld [vmem:[%s4228_s8] sm:$0xff]  ;;  %s3535_s8 = smov 64   ;;  %vm558_vm7 = vcmask 0   ;;  %s2844_s30 = sshll.u32 %s3537_s29, 4  ;;  %s4185_s30 = int_to_ptr.vmem [resolvable:$true] %s2844_s30 }
   0xf   :  { %v83_v22 = vld [vmem:[%s4239_s17] sm:$0x1]  ;;  %3033 = vmatprep.mubr.msk.f32.mxu1 %vm3530_vm0, %v3528_v8  ;;  %v3713_v28 = vrot.slane %v67_v26, %v161_v25  ;;  %v3715_v29 = vrot.slane %v67_v26, %v165_v27  ;;  %v3762_v2 = vpack.c.bf16 %v70_v0, %v69_v63 }
  0x10   :  { %3018 = vmatmul.mubr.msk.f32.vlgmr.msra.gmra.mrb[0].mxu0 %vm84_vm1, %v83_v22  ;;  %v3787_v16 = vld [vmem:[%s4229_s9] sm:$0x1] }
  0x11   :  { %3022 = vmatprep.mubr.msk.f32.mxu0 %vm3530_vm0, %v3528_v8  ;;  %3021 = vmatpush3.msra.mxu0 %v3744_v58 }
  0x12   :  { %3257 = vmatprep.subr.bf16.mxu0 %v3529_v9  ;;  %3253 = vmatpush3.bf16.msra.mxu1 %v3762_v2 }
  0x13   :  { %3254 = vmatprep.subr.bf16.mxu1 %v3529_v9 }
  0x16   :  { %3256 = vmatpush3.bf16.msra.mxu1 %v3768_v5 }
  0x17   :  { %3263 = vmatprep.subr.bf16.mxu1 %v3529_v9 }
  0xe1   :  { %v238_v30 = vpop.f32.mrb[0].mxu1 }
  0xe2   :  { %v3718_v31 = vadd.f32 %v238_v30, %v3713_v28  ;;  %v240_v32 = vpop.f32.mrb[1].mxu1 }
  0xe3   :  { %v241_v33 = vadd.f32 %v240_v32, %v3715_v29  ;;  %v154_v34 = vpop.f32.mrb[0].mxu0 }
  0xe4   :  { %244 = vrot.lane.b32.xlu0 %v3718_v31, %s3531_s19  ;;  %v3019_v35 = vpop.f32.mrb[1].mxu0  ;;  %v155_v37 = vadd.f32 %v154_v34, %v3727_v36 }
  0xe5   :  { %249 = vrot.lane.b32.xlu1 %v241_v33, %s3531_s19 }
 0x156   :  { %v245_v38 = vpop.permute.xlu0 %244 }
 0x157   :  { %v247_v39 = vadd.f32 %v245_v38, %v155_v37  ;;  %v250_v47 = vpop.permute.xlu1 %249 }
 0x158   :  { %v252_v48 = vadd.f32 %v250_v47, %v155_v37  ;;  %v2867_v47 = vld [vmem:[%s4239_s17 + $0x1] sm:$0x1] }
 0x159   :  { %v253_v40 = vmul.f32 %v247_v39, %v247_v39 }
 0x15b   :  { %v255_v41 = vsel %vm254_vm2, %v253_v40, 0.0  ;;  %v75_v40 = vld [vmem:[%s4230_s10 + $0x8] sm:$0xff] }
 0x15c   :  { %256 = vadd.xlane.f32.xlu0 %v255_v41  ;;  %v76_v41 = vld [vmem:[%s4230_s10 + $0x10] sm:$0xff] }
 0x1e9   :  { %v257_v43 = vpop.xlane.xlu0 %256 }
 0x1ea   :  { %v258_v44 = vmul.f32 %v257_v43, %v3734_v42 }
 0x1ec   :  { %3405 = vrsqrt.f32 %v258_v44 }
 0x1f6   :  { %v3406_v45 = vpop.eup %3405 }
 0x1f7   :  { %v260_v46 = vmin.f32 %v3406_v45, 1e+08 }
 0x1f9   :  { %262 = vrot.lane.b32.xlu1 %v260_v46, %s3531_s19 }
 0x26b   :  { %v263_v49 = vpop.permute.xlu1 %262 }
 0x26c   :  { %v265_v50 = vmul.f32 %v263_v49, %v252_v48 }
 0x26e   :  { %v267_v51 = vsel %vm266_vm3, %v265_v50, -inf }
 0x26f   :  { %268 = vmax.xlane.f32.xlu1 %v267_v51 }
 0x2fc   :  { %v269_v52 = vpop.xlane.xlu1 %268 }
 0x2fd   :  { %v270_v53 = vsub.f32 %v265_v50, %v269_v52 }
 0x2ff   :  { %v271_v54 = vmul.f32 1.442695, %v270_v53 }
 0x301   :  { %3407 = vpow2.f32 %v271_v54 }
 0x30b   :  { %v3408_v55 = vpop.eup %3407 }
 0x30c   :  { %274 = vrot.lane.b32.xlu0 %v3408_v55, %s3532_s23 }
 0x37e   :  { %v275_v56 = vpop.permute.xlu0 %274 }
 0x37f   :  { %v278_v57 = vsel %vm277_vm4, %v275_v56, 0.0 }
 0x380   :  { %279 = vadd.xlane.f32.xlu1 %v278_v57 }
 0x40d   :  { %v280_v59 = vpop.xlane.xlu1 %279 }
 0x40e   :  { %3409 = vrcp.f32 %v280_v59 }
 0x418   :  { %v3410_v60 = vpop.eup %3409 }
 0x419   :  { %v282_v61 = vmul.f32 %v3410_v60, %v3408_v55 }
 0x41b   :  { %284 = vrot.lane.b32.xlu1 %v282_v61, %s3532_s23 }
 0x48d   :  { %v285_v62 = vpop.permute.xlu1 %284 }
 0x48e   :  { %287 = vst.msk [vmem:[#allocation5] sm:$0x1] %vm277_vm4, %v285_v62  ;;  %3023 = vmatmul.mubr.msk.f32.vlgmr.msra.gmra.mrb[2].mxu0 %vm288_vm5, %v285_v62 }
 0x48f   :  { %3044 = vmatprep.mubr.msk.f32.mxu0 %vm3530_vm0, %v3528_v8 }
 0x561   :  { %v357_v6 = vpop.f32.mrb[2].mxu0 }
 0x562   :  { %362 = vrot.lane.b32.xlu0 %v357_v6, %s3533_s3  ;;  %v3024_v7 = vpop.f32.mrb[3].mxu0 }
 0x5d4   :  { %v363_v12 = vpop.permute.xlu0 %362 }
 0x5d5   :  { %v365_v13 = vadd.f32 %v363_v12, %v155_v37  ;;  %v468_v37 = vrot.slane %v3689_v21, %v161_v25  ;;  %v77_v21 = vld [vmem:[%s4230_s10 + $0x18] sm:$0xff] }
 0x5d6   :  { %v3811_v25 = vpack.c.bf16 %v77_v21, %v76_v41 }
 0x5d7   :  { %v366_v14 = vmax.f32 %v365_v13, 0.0 }
 0x5d9   :  { %368 = vrot.lane.b32.xlu0 %v366_v14, %s3534_s0 }
 0x5dd   :  { %449 = vrot.lane.b32.xlu0 %v3718_v31, %s3535_s8 }
 0x64b   :  { %v369_v15 = vpop.permute.xlu0 %368 }
 0x64c   :  { %3034 = vmatmul.mubr.msk.f32.vlgmr.msra.gmra.mrb[2].mxu1 %vm84_vm1, %v369_v15 }
 0x64d   :  { %3265 = vmatpush3.bf16.msra.mxu1 %v3675_v18  ;;  %3055 = vmatprep.mubr.msk.f32.mxu1 %vm3530_vm0, %v3528_v8 }
 0x64e   :  { %3266 = vmatprep.subr.bf16.mxu1 %v3529_v9 }
 0x64f   :  { %v450_v34 = vpop.permute.xlu0 %449 }
 0x651   :  { %3268 = vmatpush3.bf16.msra.mxu1 %v3682_v20 }
 0x652   :  { %3058 = vmatprep.subr.mxu1 %v3528_v8 }
 0x654   :  { %3056 = vmatmul.mubr.msk.f32.vlgmr.msra.gmra.mrb[4].mxu1 %vm84_vm1, %v2867_v47 }
 0x655   :  { %3059 = vmatpush3.msra.mxu1 %v3744_v58  ;;  %3060 = vmatprep.mubr.msk.f32.mxu1 %vm3530_vm0, %v3528_v8 }
 0x656   :  { %3283 = vmatprep.subr.bf16.mxu1 %v3529_v9 }
 0x71f   :  { %v438_v19 = vpop.f32.mrb[2].mxu1 }
 0x720   :  { %v439_v22 = vadd.f32 %v438_v19, %v3787_v16  ;;  %v3035_v23 = vpop.f32.mrb[3].mxu1 }
 0x722   :  { %v442_v26 = vadd.f32 %v439_v22, %v3718_v31  ;;  %v74_v31 = vld [vmem:[%s4230_s10] sm:$0xff]  ;;  %s3536_s10 = smov [#allocation3]  }
 0x723   :  { %v3805_v24 = vpack.c.bf16 %v75_v40, %v74_v31  ;;  %s2832_s5 = sshll.u32 %s3536_s10, 4  ;;  %s2833_s5 = int_to_ptr.vmem [resolvable:$true] %s2832_s5 }
 0x724   :  { %v2865_v27 = vmul.f32 -1.442695, %v442_v26  ;;  %s3480_s13 = scalar_lea.vmem %s2833_s5, 96  ;;  %p3485_p1 = scmp.lt.s32.totalorder %s2833_s5, %s2833_s5 }
 0x725   :  { %3259 = vmatpush3.bf16.msra.mxu0 %v3805_v24  ;;  %p3481_p0 = scmp.ne.s32.totalorder %s2833_s5, %s3480_s13  ;;  %p3486_p2 = scmp.lt.s32.totalorder %s3480_s13, %s3480_s13 }
 0x726   :  { %3411 = vpow2.f32 %v2865_v27  ;;  %3260 = vmatprep.subr.bf16.mxu0 %v3529_v9 }
 0x727   :  { %v631_v52 = vpop.f32.mrb[4].mxu1  ;;  %p3487_p3 = por %p3486_p2, %p3485_p1 }
 0x728   :  { %v3057_v53 = vpop.f32.mrb[5].mxu1  ;;  %v632_v61 = vadd.f32 %v631_v52, %v3727_v36 }
 0x729   :  { %3262 = vmatpush3.bf16.msra.mxu0 %v3811_v25  ;;  %p3488_p4 = pnand %p3487_p3, %p3481_p0 }
 0x72a   :  { %3270 = vmatprep.subr.bf16.mxu0 %v3637_v4 }
 0x730   :  { %v3412_v30 = vpop.eup %3411 }
 0x731   :  { %v446_v32 = vadd.f32 1.0, %v3412_v30 }
 0x733   :  { %3413 = vrcp.f32 %v446_v32 }
 0x73d   :  { %v3414_v33 = vpop.eup %3413 }
 0x73e   :  { %v452_v35 = vmul.f32 %v3414_v33, %v450_v34  ;;  %v459_v45 = vsub.f32 1.0, %v3414_v33 }
 0x740   :  { %454 = vrot.lane.b32.xlu1 %v452_v35, %s3535_s8 }
 0x744   :  { %469 = vrot.lane.b32.xlu1 %v468_v37, %s3531_s19 }
 0x7b2   :  { %v455_v38 = vpop.permute.xlu1 %454 }
 0x7b3   :  { %v457_v39 = vadd.f32 %v455_v38, %v439_v22 }
 0x7b5   :  { %3415 = vtanh.f32 %v457_v39 }
 0x7b6   :  { %v470_v44 = vpop.permute.xlu1 %469 }
 0x7b7   :  { %v472_v48 = vmul.f32 %v3414_v33, %v470_v44 }
 0x7bf   :  { %v3416_v43 = vpop.eup %3415 }
 0x7c0   :  { %461 = vrot.lane.b32.xlu0 %v3416_v43, %s3532_s23 }
 0x832   :  { %v462_v46 = vpop.permute.xlu0 %461 }
 0x833   :  { %v464_v49 = vmul.f32 %v462_v46, %v459_v45 }
 0x835   :  { %v3824_v50 = vadd.f32 %v472_v48, %v464_v49 }
 0x837   :  { %475 = vrot.lane.b32.xlu0 %v3824_v50, %s3532_s23 }
 0x8a9   :  { %v476_v51 = vpop.permute.xlu0 %475 }
 0x8aa   :  { %478 = vst.msk [vmem:[#allocation3] sm:$0x1] %vm254_vm2, %v476_v51  ;;  %3045 = vmatmul.mubr.msk.f32.vlgmr.msra.gmra.mrb[4].mxu0 %vm84_vm1, %v476_v51 }
 0x8ab   :  { %3272 = vmatpush1.bf16.msra.mxu0 %v3650_v10  ;;  %699 = vmatprep.mubr.f32.mxu0 %v3528_v8 }
 0x8ac   :  { %3274 = vmatprep.subr.bf16.mxu0 %v3652_v11 }
 0x8af   :  { %3276 = vmatpush1.bf16.msra.mxu0 %v3673_v17 }
 0x8b0   :  { %3277 = vmatprep.subr.bf16.mxu0 %v3529_v9 }
 0x8b2   :  { %2869 = vmatmul.mubr.msk.f32.vlgmr.msra.gmra.mrb[6].mxu0 %vm84_vm1, %v476_v51 }
 0x8b3   :  { %3279 = vmatpush3.bf16.msra.mxu0 %v3762_v2  ;;  %3071 = vmatprep.mubr.msk.f32.mxu0 %vm3530_vm0, %v3528_v8 }
 0x8b4   :  { %3280 = vmatprep.subr.bf16.mxu0 %v3529_v9 }
 0x8b7   :  { %3282 = vmatpush3.bf16.msra.mxu0 %v3768_v5 }
 0x8b8   :  { %3289 = vmatprep.subr.bf16.mxu0 %v3529_v9 }
 0x97d   :  { %v3843_v54 = vpop.f32.mrb[4].mxu0 }
 0x97e   :  { %v3046_v55 = vpop.f32.mrb[5].mxu0 }
 0x985   :  { %v701_v56 = vpop.f32.mrb[6].mxu0 }
 0x986   :  { %v3846_v57 = vadd.f32 %v701_v56, %v3713_v28  ;;  %v703_v59 = vpop.f32.mrb[7].mxu0 }
 0x987   :  { %v704_v60 = vadd.f32 %v703_v59, %v3715_v29 }
 0x988   :  { %707 = vrot.lane.b32.xlu1 %v3846_v57, %s3531_s19 }
 0x98c   :  { %712 = vrot.lane.b32.xlu1 %v704_v60, %s3531_s19 }
 0x9fa   :  { %v708_v62 = vpop.permute.xlu1 %707 }
 0x9fb   :  { %v710_v63 = vadd.f32 %v708_v62, %v632_v61 }
 0x9fd   :  { %v716_v0 = vmul.f32 %v710_v63, %v710_v63 }
 0x9fe   :  { %v713_v13 = vpop.permute.xlu1 %712 }
 0x9ff   :  { %v717_v1 = vsel %vm254_vm2, %v716_v0, 0.0  ;;  %v715_v14 = vadd.f32 %v713_v13, %v632_v61 }
 0xa00   :  { %718 = vadd.xlane.f32.xlu0 %v717_v1 }
 0xa8d   :  { %v719_v3 = vpop.xlane.xlu0 %718 }
 0xa8e   :  { %v720_v6 = vmul.f32 %v719_v3, %v3734_v42 }
 0xa90   :  { %3417 = vrsqrt.f32 %v720_v6 }
 0xa9a   :  { %v3418_v7 = vpop.eup %3417 }
 0xa9b   :  { %v722_v12 = vmin.f32 %v3418_v7, 1e+08 }
 0xa9d   :  { %724 = vrot.lane.b32.xlu1 %v722_v12, %s3531_s19 }
 0xb0f   :  { %v725_v15 = vpop.permute.xlu1 %724 }
 0xb10   :  { %v727_v19 = vmul.f32 %v725_v15, %v715_v14 }
 0xb12   :  { %v728_v22 = vsel %vm266_vm3, %v727_v19, -inf }
 0xb13   :  { %729 = vmax.xlane.f32.xlu1 %v728_v22 }
 0xba0   :  { %v730_v23 = vpop.xlane.xlu1 %729 }
 0xba1   :  { %v731_v26 = vsub.f32 %v727_v19, %v730_v23 }
 0xba3   :  { %v732_v27 = vmul.f32 1.442695, %v731_v26 }
 0xba5   :  { %3419 = vpow2.f32 %v732_v27 }
 0xbaf   :  { %v3420_v30 = vpop.eup %3419 }
 0xbb0   :  { %735 = vrot.lane.b32.xlu0 %v3420_v30, %s3532_s23 }
 0xc22   :  { %v736_v32 = vpop.permute.xlu0 %735 }
 0xc23   :  { %v738_v33 = vsel %vm277_vm4, %v736_v32, 0.0 }
 0xc24   :  { %739 = vadd.xlane.f32.xlu1 %v738_v33 }
 0xcb1   :  { %v740_v34 = vpop.xlane.xlu1 %739 }
 0xcb2   :  { %3421 = vrcp.f32 %v740_v34 }
 0xcbc   :  { %v3422_v35 = vpop.eup %3421 }
 0xcbd   :  { %v742_v37 = vmul.f32 %v3422_v35, %v3420_v30 }
 0xcbf   :  { %744 = vrot.lane.b32.xlu1 %v742_v37, %s3532_s23 }
 0xd31   :  { %v745_v38 = vpop.permute.xlu1 %744 }
 0xd32   :  { %748 = vst.msk [vmem:[#allocation5 + $0x1] sm:$0x1] %vm277_vm4, %v745_v38  ;;  %3061 = vmatmul.mubr.msk.f32.vlgmr.msra.gmra.mrb[6].mxu1 %vm288_vm5, %v745_v38 }
 0xd33   :  { %3285 = vmatpush3.bf16.msra.mxu1 %v3805_v24  ;;  %3082 = vmatprep.mubr.msk.f32.mxu1 %vm3530_vm0, %v3528_v8 }
 0xd34   :  { %3286 = vmatprep.subr.bf16.mxu1 %v3529_v9 }
 0xd37   :  { %3288 = vmatpush3.bf16.msra.mxu1 %v3811_v25 }
 0xd38   :  { %3296 = vmatprep.subr.bf16.mxu1 %v3637_v4 }
 0xe05   :  { %v817_v39 = vpop.f32.mrb[6].mxu1 }
 0xe06   :  { %822 = vrot.lane.b32.xlu0 %v817_v39, %s3533_s3  ;;  %v3062_v31 = vpop.f32.mrb[7].mxu1 }
 0xe78   :  { %v823_v40 = vpop.permute.xlu0 %822 }
 0xe79   :  { %v825_v41 = vadd.f32 %v823_v40, %v632_v61 }
 0xe7b   :  { %v826_v21 = vmax.f32 %v825_v41, 0.0 }
 0xe7d   :  { %828 = vrot.lane.b32.xlu0 %v826_v21, %s3534_s0 }
 0xe81   :  { %909 = vrot.lane.b32.xlu0 %v3846_v57, %s3535_s8 }
 0xeef   :  { %v829_v43 = vpop.permute.xlu0 %828 }
 0xef0   :  { %3072 = vmatmul.mubr.msk.f32.vlgmr.msra.gmra.mrb[8].mxu0 %vm84_vm1, %v829_v43 }
 0xef1   :  { %3291 = vmatpush3.bf16.msra.mxu0 %v3675_v18  ;;  %3093 = vmatprep.mubr.msk.f32.mxu0 %vm3530_vm0, %v3528_v8 }
 0xef2   :  { %3292 = vmatprep.subr.bf16.mxu0 %v3529_v9 }
 0xef3   :  { %v910_v53 = vpop.permute.xlu0 %909 }
 0xef5   :  { %3294 = vmatpush3.bf16.msra.mxu0 %v3682_v20 }
 0xef6   :  { %3096 = vmatprep.subr.mxu0 %v3528_v8 }
 0xfc3   :  { %v898_v44 = vpop.f32.mrb[8].mxu0 }
 0xfc4   :  { %v899_v45 = vadd.f32 %v898_v44, %v3787_v16  ;;  %v3073_v46 = vpop.f32.mrb[9].mxu0 }
 0xfc6   :  { %v902_v47 = vadd.f32 %v899_v45, %v3846_v57  ;;  %v2875_v57 = vld [vmem:[%s4239_s17 + $0x2] sm:$0x1] }
 0xfc7   :  { %3094 = vmatmul.mubr.msk.f32.vlgmr.msra.gmra.mrb[10].mxu0 %vm84_vm1, %v2875_v57 }
 0xfc8   :  { %v2872_v48 = vmul.f32 -1.442695, %v902_v47  ;;  %3097 = vmatpush3.msra.mxu0 %v3744_v58  ;;  %3098 = vmatprep.mubr.msk.f32.mxu0 %vm3530_vm0, %v3528_v8 }
 0xfc9   :  { %3309 = vmatprep.subr.bf16.mxu0 %v3529_v9 }
 0xfca   :  { %3423 = vpow2.f32 %v2872_v48 }
 0xfd4   :  { %v3424_v49 = vpop.eup %3423 }
 0xfd5   :  { %v906_v51 = vadd.f32 1.0, %v3424_v49 }
 0xfd7   :  { %3425 = vrcp.f32 %v906_v51 }
 0xfe1   :  { %v3426_v52 = vpop.eup %3425 }
 0xfe2   :  { %v912_v55 = vmul.f32 %v3426_v52, %v910_v53  ;;  %v919_v61 = vsub.f32 1.0, %v3426_v52  ;;  %v925_v63 = vmul.f32 %v3426_v52, %v3824_v50 }
 0xfe4   :  { %914 = vrot.lane.b32.xlu0 %v912_v55, %s3535_s8 }
0x1056   :  { %v915_v56 = vpop.permute.xlu0 %914 }
0x1057   :  { %v917_v59 = vadd.f32 %v915_v56, %v899_v45 }
0x1059   :  { %3427 = vtanh.f32 %v917_v59 }
0x1063   :  { %v3428_v60 = vpop.eup %3427 }
0x1064   :  { %921 = vrot.lane.b32.xlu1 %v3428_v60, %s3532_s23 }
0x109a   :  { %v1084_v50 = vpop.f32.mrb[10].mxu0 }
0x109b   :  { %v3095_v6 = vpop.f32.mrb[11].mxu0  ;;  %v1085_v22 = vadd.f32 %v1084_v50, %v3727_v36 }
0x10d6   :  { %v922_v62 = vpop.permute.xlu1 %921 }
0x10d7   :  { %v924_v0 = vmul.f32 %v922_v62, %v919_v61 }
0x10d9   :  { %v3891_v1 = vadd.f32 %v925_v63, %v924_v0 }
0x10db   :  { %928 = vrot.lane.b32.xlu0 %v3891_v1, %s3532_s23 }
0x114d   :  { %v929_v3 = vpop.permute.xlu0 %928 }
0x114e   :  { %932 = vst.msk [vmem:[#allocation3 + $0x1] sm:$0x1] %vm254_vm2, %v929_v3  ;;  %3083 = vmatmul.mubr.msk.f32.vlgmr.msra.gmra.mrb[8].mxu1 %vm84_vm1, %v929_v3 }
0x114f   :  { %3298 = vmatpush1.bf16.msra.mxu1 %v3650_v10  ;;  %1152 = vmatprep.mubr.f32.mxu1 %v3528_v8 }
0x1150   :  { %3300 = vmatprep.subr.bf16.mxu1 %v3652_v11 }
0x1153   :  { %3302 = vmatpush1.bf16.msra.mxu1 %v3673_v17 }
0x1154   :  { %3303 = vmatprep.subr.bf16.mxu1 %v3529_v9 }
0x1156   :  { %2877 = vmatmul.mubr.msk.f32.vlgmr.msra.gmra.mrb[10].mxu1 %vm84_vm1, %v929_v3 }
0x1157   :  { %3305 = vmatpush3.bf16.msra.mxu1 %v3762_v2  ;;  %3109 = vmatprep.mubr.msk.f32.mxu1 %vm3530_vm0, %v3528_v8 }
0x1158   :  { %3306 = vmatprep.subr.bf16.mxu1 %v3529_v9 }
0x115b   :  { %3308 = vmatpush3.bf16.msra.mxu1 %v3768_v5 }
0x115c   :  { %3315 = vmatprep.subr.bf16.mxu1 %v3529_v9 }
0x1221   :  { %v3910_v7 = vpop.f32.mrb[8].mxu1 }
0x1222   :  { %v3084_v12 = vpop.f32.mrb[9].mxu1 }
0x1229   :  { %v1154_v13 = vpop.f32.mrb[10].mxu1 }
0x122a   :  { %v3913_v14 = vadd.f32 %v1154_v13, %v3713_v28  ;;  %v1156_v15 = vpop.f32.mrb[11].mxu1 }
0x122b   :  { %v1157_v19 = vadd.f32 %v1156_v15, %v3715_v29 }
0x122c   :  { %1160 = vrot.lane.b32.xlu1 %v3913_v14, %s3531_s19 }
0x1230   :  { %1165 = vrot.lane.b32.xlu1 %v1157_v19, %s3531_s19 }
0x129e   :  { %v1161_v23 = vpop.permute.xlu1 %1160 }
0x129f   :  { %v1163_v26 = vadd.f32 %v1161_v23, %v1085_v22 }
0x12a1   :  { %v1169_v27 = vmul.f32 %v1163_v26, %v1163_v26 }
0x12a2   :  { %v1166_v37 = vpop.permute.xlu1 %1165 }
0x12a3   :  { %v1170_v30 = vsel %vm254_vm2, %v1169_v27, 0.0  ;;  %v1168_v38 = vadd.f32 %v1166_v37, %v1085_v22 }
0x12a4   :  { %1171 = vadd.xlane.f32.xlu0 %v1170_v30 }
0x1331   :  { %v1172_v32 = vpop.xlane.xlu0 %1171 }
0x1332   :  { %v1173_v33 = vmul.f32 %v1172_v32, %v3734_v42 }
0x1334   :  { %3429 = vrsqrt.f32 %v1173_v33 }
0x133e   :  { %v3430_v34 = vpop.eup %3429 }
0x133f   :  { %v1175_v35 = vmin.f32 %v3430_v34, 1e+08 }
0x1341   :  { %1177 = vrot.lane.b32.xlu1 %v1175_v35, %s3531_s19 }
0x13b3   :  { %v1178_v39 = vpop.permute.xlu1 %1177 }
0x13b4   :  { %v1180_v31 = vmul.f32 %v1178_v39, %v1168_v38 }
0x13b6   :  { %v1181_v40 = vsel %vm266_vm3, %v1180_v31, -inf }
0x13b7   :  { %1182 = vmax.xlane.f32.xlu1 %v1181_v40 }
0x1444   :  { %v1183_v41 = vpop.xlane.xlu1 %1182 }
0x1445   :  { %v1184_v21 = vsub.f32 %v1180_v31, %v1183_v41 }
0x1447   :  { %v1185_v43 = vmul.f32 1.442695, %v1184_v21 }
0x1449   :  { %3431 = vpow2.f32 %v1185_v43 }
0x1453   :  { %v3432_v44 = vpop.eup %3431 }
0x1454   :  { %1188 = vrot.lane.b32.xlu0 %v3432_v44, %s3532_s23 }
0x14c6   :  { %v1189_v45 = vpop.permute.xlu0 %1188 }
0x14c7   :  { %v1191_v46 = vsel %vm277_vm4, %v1189_v45, 0.0 }
0x14c8   :  { %1192 = vadd.xlane.f32.xlu1 %v1191_v46 }
0x1555   :  { %v1193_v47 = vpop.xlane.xlu1 %1192 }
0x1556   :  { %3433 = vrcp.f32 %v1193_v47 }
0x1560   :  { %v3434_v48 = vpop.eup %3433 }
0x1561   :  { %v1195_v49 = vmul.f32 %v3434_v48, %v3432_v44 }
0x1563   :  { %1197 = vrot.lane.b32.xlu1 %v1195_v49, %s3532_s23 }
0x15d5   :  { %v1198_v51 = vpop.permute.xlu1 %1197 }
0x15d6   :  { %1201 = vst.msk [vmem:[#allocation5 + $0x2] sm:$0x1] %vm277_vm4, %v1198_v51  ;;  %3099 = vmatmul.mubr.msk.f32.vlgmr.msra.gmra.mrb[12].mxu0 %vm288_vm5, %v1198_v51 }
0x15d7   :  { %3311 = vmatpush3.bf16.msra.mxu0 %v3805_v24  ;;  %3120 = vmatprep.mubr.msk.f32.mxu0 %vm3530_vm0, %v3528_v8 }
0x15d8   :  { %3312 = vmatprep.subr.bf16.mxu0 %v3529_v9 }
0x15db   :  { %3314 = vmatpush3.bf16.msra.mxu0 %v3811_v25 }
0x15dc   :  { %3322 = vmatprep.subr.bf16.mxu0 %v3637_v4 }
0x16a9   :  { %v1270_v52 = vpop.f32.mrb[12].mxu0 }
0x16aa   :  { %1275 = vrot.lane.b32.xlu0 %v1270_v52, %s3533_s3  ;;  %v3100_v53 = vpop.f32.mrb[13].mxu0 }
0x171c   :  { %v1276_v55 = vpop.permute.xlu0 %1275 }
0x171d   :  { %v1278_v56 = vadd.f32 %v1276_v55, %v1085_v22 }
0x171f   :  { %v1279_v59 = vmax.f32 %v1278_v56, 0.0 }
0x1721   :  { %1281 = vrot.lane.b32.xlu0 %v1279_v59, %s3534_s0 }
0x1725   :  { %1362 = vrot.lane.b32.xlu0 %v3913_v14, %s3535_s8 }
0x1793   :  { %v1282_v60 = vpop.permute.xlu0 %1281 }
0x1794   :  { %3110 = vmatmul.mubr.msk.f32.vlgmr.msra.gmra.mrb[12].mxu1 %vm84_vm1, %v1282_v60 }
0x1795   :  { %3317 = vmatpush3.bf16.msra.mxu1 %v3675_v18  ;;  %3131 = vmatprep.mubr.msk.f32.mxu1 %vm3530_vm0, %v3528_v8 }
0x1796   :  { %3318 = vmatprep.subr.bf16.mxu1 %v3529_v9 }
0x1797   :  { %v1363_v12 = vpop.permute.xlu0 %1362 }
0x1799   :  { %3320 = vmatpush3.bf16.msra.mxu1 %v3682_v20 }
0x179a   :  { %3134 = vmatprep.subr.mxu1 %v3528_v8 }
0x1867   :  { %v1351_v61 = vpop.f32.mrb[12].mxu1 }
0x1868   :  { %v1352_v62 = vadd.f32 %v1351_v61, %v3787_v16  ;;  %v3111_v57 = vpop.f32.mrb[13].mxu1 }
0x186a   :  { %v1355_v63 = vadd.f32 %v1352_v62, %v3913_v14  ;;  %v2883_v14 = vld [vmem:[%s4239_s17 + $0x3] sm:$0x1] }
0x186b   :  { %3132 = vmatmul.mubr.msk.f32.vlgmr.msra.gmra.mrb[14].mxu1 %vm84_vm1, %v2883_v14 }
0x186c   :  { %v2880_v0 = vmul.f32 -1.442695, %v1355_v63  ;;  %3135 = vmatpush3.msra.mxu1 %v3744_v58  ;;  %3136 = vmatprep.mubr.msk.f32.mxu1 %vm3530_vm0, %v3528_v8 }
0x186d   :  { %3335 = vmatprep.subr.bf16.mxu1 %v3529_v9 }
0x186e   :  { %3435 = vpow2.f32 %v2880_v0 }
0x1878   :  { %v3436_v3 = vpop.eup %3435 }
0x1879   :  { %v1359_v50 = vadd.f32 1.0, %v3436_v3 }
0x187b   :  { %3437 = vrcp.f32 %v1359_v50 }
0x1885   :  { %v3438_v6 = vpop.eup %3437 }
0x1886   :  { %v1365_v13 = vmul.f32 %v3438_v6, %v1363_v12  ;;  %v1372_v23 = vsub.f32 1.0, %v3438_v6  ;;  %v1378_v27 = vmul.f32 %v3438_v6, %v3891_v1 }
0x1888   :  { %1367 = vrot.lane.b32.xlu0 %v1365_v13, %s3535_s8 }
0x18fa   :  { %v1368_v15 = vpop.permute.xlu0 %1367 }
0x18fb   :  { %v1370_v19 = vadd.f32 %v1368_v15, %v1352_v62 }
0x18fd   :  { %3439 = vtanh.f32 %v1370_v19 }
0x1907   :  { %v3440_v22 = vpop.eup %3439 }
0x1908   :  { %1374 = vrot.lane.b32.xlu1 %v3440_v22, %s3532_s23 }
0x193e   :  { %v1537_v1 = vpop.f32.mrb[14].mxu1 }
0x193f   :  { %v3133_v34 = vpop.f32.mrb[15].mxu1  ;;  %v1538_v41 = vadd.f32 %v1537_v1, %v3727_v36 }
0x197a   :  { %v1375_v26 = vpop.permute.xlu1 %1374 }
0x197b   :  { %v1377_v30 = vmul.f32 %v1375_v26, %v1372_v23 }
0x197d   :  { %v3958_v32 = vadd.f32 %v1378_v27, %v1377_v30 }
0x197f   :  { %1381 = vrot.lane.b32.xlu0 %v3958_v32, %s3532_s23 }
0x19f1   :  { %v1382_v33 = vpop.permute.xlu0 %1381 }
0x19f2   :  { %1385 = vst.msk [vmem:[#allocation3 + $0x2] sm:$0x1] %vm254_vm2, %v1382_v33  ;;  %3121 = vmatmul.mubr.msk.f32.vlgmr.msra.gmra.mrb[14].mxu0 %vm84_vm1, %v1382_v33 }
0x19f3   :  { %3324 = vmatpush1.bf16.msra.mxu0 %v3650_v10  ;;  %1605 = vmatprep.mubr.f32.mxu0 %v3528_v8 }
0x19f4   :  { %3326 = vmatprep.subr.bf16.mxu0 %v3652_v11 }
0x19f7   :  { %3328 = vmatpush1.bf16.msra.mxu0 %v3673_v17 }
0x19f8   :  { %3329 = vmatprep.subr.bf16.mxu0 %v3529_v9 }
0x19fa   :  { %2885 = vmatmul.mubr.msk.f32.vlgmr.msra.gmra.mrb[16].mxu0 %vm84_vm1, %v1382_v33 }
0x19fb   :  { %3331 = vmatpush3.bf16.msra.mxu0 %v3762_v2  ;;  %3147 = vmatprep.mubr.msk.f32.mxu0 %vm3530_vm0, %v3528_v8 }
0x19fc   :  { %3332 = vmatprep.subr.bf16.mxu0 %v3529_v9 }
0x19ff   :  { %3334 = vmatpush3.bf16.msra.mxu0 %v3768_v5 }
0x1a00   :  { %3341 = vmatprep.subr.bf16.mxu0 %v3529_v9 }
0x1ac5   :  { %v3977_v35 = vpop.f32.mrb[14].mxu0 }
0x1ac6   :  { %v3122_v37 = vpop.f32.mrb[15].mxu0 }
0x1acd   :  { %v1607_v38 = vpop.f32.mrb[16].mxu0 }
0x1ace   :  { %v3980_v39 = vadd.f32 %v1607_v38, %v3713_v28  ;;  %v1609_v31 = vpop.f32.mrb[17].mxu0 }
0x1acf   :  { %v1610_v40 = vadd.f32 %v1609_v31, %v3715_v29 }
0x1ad0   :  { %1613 = vrot.lane.b32.xlu1 %v3980_v39, %s3531_s19 }
0x1ad4   :  { %1618 = vrot.lane.b32.xlu1 %v1610_v40, %s3531_s19 }
0x1b42   :  { %v1614_v21 = vpop.permute.xlu1 %1613 }
0x1b43   :  { %v1616_v43 = vadd.f32 %v1614_v21, %v1538_v41 }
0x1b45   :  { %v1622_v44 = vmul.f32 %v1616_v43, %v1616_v43 }
0x1b46   :  { %v1619_v51 = vpop.permute.xlu1 %1618 }
0x1b47   :  { %v1623_v45 = vsel %vm254_vm2, %v1622_v44, 0.0  ;;  %v1621_v52 = vadd.f32 %v1619_v51, %v1538_v41 }
0x1b48   :  { %1624 = vadd.xlane.f32.xlu0 %v1623_v45 }
0x1bd5   :  { %v1625_v46 = vpop.xlane.xlu0 %1624 }
0x1bd6   :  { %v1626_v47 = vmul.f32 %v1625_v46, %v3734_v42 }
0x1bd8   :  { %3441 = vrsqrt.f32 %v1626_v47 }
0x1be2   :  { %v3442_v48 = vpop.eup %3441 }
0x1be3   :  { %v1628_v49 = vmin.f32 %v3442_v48, 1e+08 }
0x1be5   :  { %1630 = vrot.lane.b32.xlu1 %v1628_v49, %s3531_s19 }
0x1c57   :  { %v1631_v53 = vpop.permute.xlu1 %1630 }
0x1c58   :  { %v1633_v55 = vmul.f32 %v1631_v53, %v1621_v52 }
0x1c5a   :  { %v1634_v56 = vsel %vm266_vm3, %v1633_v55, -inf }
0x1c5b   :  { %1635 = vmax.xlane.f32.xlu1 %v1634_v56 }
0x1ce8   :  { %v1636_v59 = vpop.xlane.xlu1 %1635 }
0x1ce9   :  { %v1637_v60 = vsub.f32 %v1633_v55, %v1636_v59 }
0x1ceb   :  { %v1638_v61 = vmul.f32 1.442695, %v1637_v60 }
0x1ced   :  { %3443 = vpow2.f32 %v1638_v61 }
0x1cf7   :  { %v3444_v62 = vpop.eup %3443 }
0x1cf8   :  { %1641 = vrot.lane.b32.xlu0 %v3444_v62, %s3532_s23 }
0x1d6a   :  { %v1642_v57 = vpop.permute.xlu0 %1641 }
0x1d6b   :  { %v1644_v63 = vsel %vm277_vm4, %v1642_v57, 0.0 }
0x1d6c   :  { %1645 = vadd.xlane.f32.xlu1 %v1644_v63 }
0x1df9   :  { %v1646_v0 = vpop.xlane.xlu1 %1645 }
0x1dfa   :  { %3445 = vrcp.f32 %v1646_v0 }
0x1e04   :  { %v3446_v3 = vpop.eup %3445 }
0x1e05   :  { %v1648_v50 = vmul.f32 %v3446_v3, %v3444_v62 }
0x1e07   :  { %1650 = vrot.lane.b32.xlu1 %v1648_v50, %s3532_s23 }
0x1e79   :  { %v1651_v6 = vpop.permute.xlu1 %1650 }
0x1e7a   :  { %1654 = vst.msk [vmem:[#allocation5 + $0x3] sm:$0x1] %vm277_vm4, %v1651_v6  ;;  %3137 = vmatmul.mubr.msk.f32.vlgmr.msra.gmra.mrb[16].mxu1 %vm288_vm5, %v1651_v6 }
0x1e7b   :  { %3337 = vmatpush3.bf16.msra.mxu1 %v3805_v24  ;;  %3158 = vmatprep.mubr.msk.f32.mxu1 %vm3530_vm0, %v3528_v8 }
0x1e7c   :  { %3338 = vmatprep.subr.bf16.mxu1 %v3529_v9 }
0x1e7f   :  { %3340 = vmatpush3.bf16.msra.mxu1 %v3811_v25 }
0x1e80   :  { %3348 = vmatprep.subr.bf16.mxu1 %v3637_v4 }
0x1f4d   :  { %v1723_v12 = vpop.f32.mrb[16].mxu1 }
0x1f4e   :  { %1728 = vrot.lane.b32.xlu0 %v1723_v12, %s3533_s3  ;;  %v3138_v13 = vpop.f32.mrb[17].mxu1 }
0x1fc0   :  { %v1729_v15 = vpop.permute.xlu0 %1728 }
0x1fc1   :  { %v1731_v19 = vadd.f32 %v1729_v15, %v1538_v41 }
0x1fc3   :  { %v1732_v22 = vmax.f32 %v1731_v19, 0.0 }
0x1fc5   :  { %1734 = vrot.lane.b32.xlu0 %v1732_v22, %s3534_s0 }
0x1fc9   :  { %1815 = vrot.lane.b32.xlu0 %v3980_v39, %s3535_s8 }
0x2037   :  { %v1735_v23 = vpop.permute.xlu0 %1734 }
0x2038   :  { %3148 = vmatmul.mubr.msk.f32.vlgmr.msra.gmra.mrb[18].mxu0 %vm84_vm1, %v1735_v23 }
0x2039   :  { %3343 = vmatpush3.bf16.msra.mxu0 %v3675_v18  ;;  %3169 = vmatprep.mubr.msk.f32.mxu0 %vm3530_vm0, %v3528_v8 }
0x203a   :  { %3344 = vmatprep.subr.bf16.mxu0 %v3529_v9 }
0x203b   :  { %v1816_v38 = vpop.permute.xlu0 %1815 }
0x203d   :  { %3346 = vmatpush3.bf16.msra.mxu0 %v3682_v20 }
0x203e   :  { %3172 = vmatprep.subr.mxu0 %v3528_v8 }
0x210b   :  { %v1804_v26 = vpop.f32.mrb[18].mxu0 }
0x210c   :  { %v1805_v14 = vadd.f32 %v1804_v26, %v3787_v16  ;;  %v3149_v27 = vpop.f32.mrb[19].mxu0 }
0x210e   :  { %v1808_v30 = vadd.f32 %v1805_v14, %v3980_v39  ;;  %v2891_v39 = vld [vmem:[%s4239_s17 + $0x4] sm:$0x1] }
0x210f   :  { %3170 = vmatmul.mubr.msk.f32.vlgmr.msra.gmra.mrb[20].mxu0 %vm84_vm1, %v2891_v39 }
0x2110   :  { %v2888_v33 = vmul.f32 -1.442695, %v1808_v30  ;;  %3173 = vmatpush3.msra.mxu0 %v3744_v58  ;;  %3174 = vmatprep.mubr.msk.f32.mxu0 %vm3530_vm0, %v3528_v8 }
0x2111   :  { %3361 = vmatprep.subr.bf16.mxu0 %v3529_v9 }
0x2112   :  { %3447 = vpow2.f32 %v2888_v33 }
0x211c   :  { %v3448_v1 = vpop.eup %3447 }
0x211d   :  { %v1812_v34 = vadd.f32 1.0, %v3448_v1 }
0x211f   :  { %3449 = vrcp.f32 %v1812_v34 }
0x2129   :  { %v3450_v37 = vpop.eup %3449 }
0x212a   :  { %v1818_v31 = vmul.f32 %v3450_v37, %v1816_v38  ;;  %v1825_v43 = vsub.f32 1.0, %v3450_v37  ;;  %v1831_v45 = vmul.f32 %v3450_v37, %v3958_v32 }
0x212c   :  { %1820 = vrot.lane.b32.xlu0 %v1818_v31, %s3535_s8 }
0x219e   :  { %v1821_v40 = vpop.permute.xlu0 %1820 }
0x219f   :  { %v1823_v41 = vadd.f32 %v1821_v40, %v1805_v14 }
0x21a1   :  { %3451 = vtanh.f32 %v1823_v41 }
0x21ab   :  { %v3452_v21 = vpop.eup %3451 }
0x21ac   :  { %1827 = vrot.lane.b32.xlu1 %v3452_v21, %s3532_s23 }
0x21e2   :  { %v1990_v32 = vpop.f32.mrb[20].mxu0 }
0x21e3   :  { %v3171_v49 = vpop.f32.mrb[21].mxu0  ;;  %v1991_v60 = vadd.f32 %v1990_v32, %v3727_v36 }
0x221e   :  { %v1828_v44 = vpop.permute.xlu1 %1827 }
0x221f   :  { %v1830_v46 = vmul.f32 %v1828_v44, %v1825_v43 }
0x2221   :  { %v4025_v47 = vadd.f32 %v1831_v45, %v1830_v46 }
0x2223   :  { %1834 = vrot.lane.b32.xlu0 %v4025_v47, %s3532_s23 }
0x2295   :  { %v1835_v48 = vpop.permute.xlu0 %1834 }
0x2296   :  { %1838 = vst.msk [vmem:[#allocation3 + $0x3] sm:$0x1] %vm254_vm2, %v1835_v48  ;;  %3159 = vmatmul.mubr.msk.f32.vlgmr.msra.gmra.mrb[18].mxu1 %vm84_vm1, %v1835_v48 }
0x2297   :  { %3350 = vmatpush1.bf16.msra.mxu1 %v3650_v10  ;;  %2058 = vmatprep.mubr.f32.mxu1 %v3528_v8 }
0x2298   :  { %3352 = vmatprep.subr.bf16.mxu1 %v3652_v11 }
0x229b   :  { %3354 = vmatpush1.bf16.msra.mxu1 %v3673_v17 }
0x229c   :  { %3355 = vmatprep.subr.bf16.mxu1 %v3529_v9 }
0x229e   :  { %2893 = vmatmul.mubr.msk.f32.vlgmr.msra.gmra.mrb[20].mxu1 %vm84_vm1, %v1835_v48 }
0x229f   :  { %3357 = vmatpush3.bf16.msra.mxu1 %v3762_v2  ;;  %3185 = vmatprep.mubr.msk.f32.mxu1 %vm3530_vm0, %v3528_v8 }
0x22a0   :  { %3358 = vmatprep.subr.bf16.mxu1 %v3529_v9 }
0x22a3   :  { %3360 = vmatpush3.bf16.msra.mxu1 %v3768_v5 }
0x22a4   :  { %3367 = vmatprep.subr.bf16.mxu1 %v3529_v9 }
0x2369   :  { %v4044_v51 = vpop.f32.mrb[18].mxu1 }
0x236a   :  { %v3160_v52 = vpop.f32.mrb[19].mxu1 }
0x2371   :  { %v2060_v53 = vpop.f32.mrb[20].mxu1 }
0x2372   :  { %v4047_v55 = vadd.f32 %v2060_v53, %v3713_v28  ;;  %v2062_v56 = vpop.f32.mrb[21].mxu1 }
0x2373   :  { %v2063_v59 = vadd.f32 %v2062_v56, %v3715_v29 }
0x2374   :  { %2066 = vrot.lane.b32.xlu1 %v4047_v55, %s3531_s19 }
0x2378   :  { %2071 = vrot.lane.b32.xlu1 %v2063_v59, %s3531_s19 }
0x23e6   :  { %v2067_v61 = vpop.permute.xlu1 %2066 }
0x23e7   :  { %v2069_v62 = vadd.f32 %v2067_v61, %v1991_v60 }
0x23e9   :  { %v2075_v57 = vmul.f32 %v2069_v62, %v2069_v62 }
0x23ea   :  { %v2072_v12 = vpop.permute.xlu1 %2071 }
0x23eb   :  { %v2076_v63 = vsel %vm254_vm2, %v2075_v57, 0.0  ;;  %v2074_v13 = vadd.f32 %v2072_v12, %v1991_v60 }
0x23ec   :  { %2077 = vadd.xlane.f32.xlu0 %v2076_v63 }
0x2479   :  { %v2078_v0 = vpop.xlane.xlu0 %2077 }
0x247a   :  { %v2079_v3 = vmul.f32 %v2078_v0, %v3734_v42  ;;  %v3477_v0 = vld [vmem:[%s4224_s4] sm:$0x1] }
0x247c   :  { %3453 = vrsqrt.f32 %v2079_v3 }
0x2486   :  { %v3454_v50 = vpop.eup %3453 }
0x2487   :  { %v2081_v6 = vmin.f32 %v3454_v50, 1e+08 }
0x2489   :  { %2083 = vrot.lane.b32.xlu1 %v2081_v6, %s3531_s19 }
0x24fb   :  { %v2084_v15 = vpop.permute.xlu1 %2083 }
0x24fc   :  { %v2086_v19 = vmul.f32 %v2084_v15, %v2074_v13 }
0x24fe   :  { %v2087_v36 = vsel %vm266_vm3, %v2086_v19, -inf }
0x24ff   :  { %2088 = vmax.xlane.f32.xlu1 %v2087_v36 }
0x258c   :  { %v2089_v22 = vpop.xlane.xlu1 %2088 }
0x258d   :  { %v2090_v23 = vsub.f32 %v2086_v19, %v2089_v22 }
0x258f   :  { %v2091_v26 = vmul.f32 1.442695, %v2090_v23 }
0x2591   :  { %3455 = vpow2.f32 %v2091_v26 }
0x259b   :  { %v3456_v14 = vpop.eup %3455 }
0x259c   :  { %2094 = vrot.lane.b32.xlu0 %v3456_v14, %s3532_s23 }
0x260e   :  { %v2095_v42 = vpop.permute.xlu0 %2094 }
0x260f   :  { %v2097_v27 = vsel %vm277_vm4, %v2095_v42, 0.0 }
0x2610   :  { %2098 = vadd.xlane.f32.xlu1 %v2097_v27 }
0x269d   :  { %v2099_v30 = vpop.xlane.xlu1 %2098 }
0x269e   :  { %3457 = vrcp.f32 %v2099_v30 }
0x26a8   :  { %v3458_v33 = vpop.eup %3457 }
0x26a9   :  { %v2101_v1 = vmul.f32 %v3458_v33, %v3456_v14 }
0x26ab   :  { %2103 = vrot.lane.b32.xlu1 %v2101_v1, %s3532_s23 }
0x271d   :  { %v2104_v34 = vpop.permute.xlu1 %2103 }
0x271e   :  { %2107 = vst.msk [vmem:[#allocation5 + $0x4] sm:$0x1] %vm277_vm4, %v2104_v34  ;;  %3175 = vmatmul.mubr.msk.f32.vlgmr.msra.gmra.mrb[22].mxu0 %vm288_vm5, %v2104_v34 }
0x271f   :  { %3363 = vmatpush3.bf16.msra.mxu0 %v3805_v24  ;;  %3196 = vmatprep.mubr.msk.f32.mxu0 %vm3530_vm0, %v3528_v8 }
0x2720   :  { %3364 = vmatprep.subr.bf16.mxu0 %v3529_v9 }
0x2723   :  { %3366 = vmatpush3.bf16.msra.mxu0 %v3811_v25 }
0x2724   :  { %3374 = vmatprep.subr.bf16.mxu0 %v3637_v4 }
0x27f1   :  { %v2176_v37 = vpop.f32.mrb[22].mxu0 }
0x27f2   :  { %2181 = vrot.lane.b32.xlu0 %v2176_v37, %s3533_s3  ;;  %v3176_v38 = vpop.f32.mrb[23].mxu0 }
0x2864   :  { %v2182_v31 = vpop.permute.xlu0 %2181 }
0x2865   :  { %v2184_v40 = vadd.f32 %v2182_v31, %v1991_v60 }
0x2867   :  { %v2185_v41 = vmax.f32 %v2184_v40, 0.0 }
0x2869   :  { %2187 = vrot.lane.b32.xlu0 %v2185_v41, %s3534_s0 }
0x286d   :  { %2268 = vrot.lane.b32.xlu0 %v4047_v55, %s3535_s8 }
0x28db   :  { %v2188_v21 = vpop.permute.xlu0 %2187 }
0x28dc   :  { %3186 = vmatmul.mubr.msk.f32.vlgmr.msra.gmra.mrb[22].mxu1 %vm84_vm1, %v2188_v21 }
0x28dd   :  { %3369 = vmatpush3.bf16.msra.mxu1 %v3675_v18  ;;  %3207 = vmatprep.mubr.msk.f32.mxu1 %vm3530_vm0, %v3528_v8 }
0x28de   :  { %3370 = vmatprep.subr.bf16.mxu1 %v3529_v9 }
0x28df   :  { %v2269_v32 = vpop.permute.xlu0 %2268 }
0x28e1   :  { %3372 = vmatpush3.bf16.msra.mxu1 %v3682_v20 }
0x28e2   :  { %3210 = vmatprep.subr.mxu1 %v3528_v8 }
0x29af   :  { %v2257_v4 = vpop.f32.mrb[22].mxu1 }
0x29b0   :  { %v2258_v43 = vadd.f32 %v2257_v4, %v3787_v16  ;;  %v3187_v44 = vpop.f32.mrb[23].mxu1 }
0x29b2   :  { %v2261_v39 = vadd.f32 %v2258_v43, %v4047_v55  ;;  %v2899_v55 = vld [vmem:[%s4239_s17 + $0x5] sm:$0x1] }
0x29b3   :  { %3208 = vmatmul.mubr.msk.f32.vlgmr.msra.gmra.mrb[24].mxu1 %vm84_vm1, %v2899_v55 }
0x29b4   :  { %v2896_v45 = vmul.f32 -1.442695, %v2261_v39  ;;  %3211 = vmatpush3.msra.mxu1 %v3744_v58  ;;  %3212 = vmatprep.mubr.msk.f32.mxu1 %vm3530_vm0, %v3528_v8 }
0x29b5   :  { %3387 = vmatprep.subr.bf16.mxu1 %v3529_v9 }
0x29b6   :  { %3459 = vpow2.f32 %v2896_v45 }
0x29c0   :  { %v3460_v46 = vpop.eup %3459 }
0x29c1   :  { %v2265_v48 = vadd.f32 1.0, %v3460_v46 }
0x29c3   :  { %3461 = vrcp.f32 %v2265_v48 }
0x29cd   :  { %v3462_v18 = vpop.eup %3461 }
0x29ce   :  { %v2271_v49 = vmul.f32 %v3462_v18, %v2269_v32  ;;  %v2278_v16 = vsub.f32 1.0, %v3462_v18  ;;  %v2284_v59 = vmul.f32 %v3462_v18, %v4025_v47 }
0x29d0   :  { %2273 = vrot.lane.b32.xlu0 %v2271_v49, %s3535_s8 }
0x2a42   :  { %v2274_v52 = vpop.permute.xlu0 %2273 }
0x2a43   :  { %v2276_v20 = vadd.f32 %v2274_v52, %v2258_v43 }
0x2a45   :  { %3463 = vtanh.f32 %v2276_v20 }
0x2a4f   :  { %v3464_v53 = vpop.eup %3463 }
0x2a50   :  { %2280 = vrot.lane.b32.xlu1 %v3464_v53, %s3532_s23 }
0x2ac2   :  { %v2281_v56 = vpop.permute.xlu1 %2280 }
0x2ac3   :  { %v2283_v60 = vmul.f32 %v2281_v56, %v2278_v16  ;;  %v78_v56 = vld [vmem:[%s4231_s11] sm:$0x1] }
0x2ac4   :  { %v548_v55 = vadd.f32 %v3843_v54, %v78_v56 }
0x2ac5   :  { %v4092_v61 = vadd.f32 %v2284_v59, %v2283_v60  ;;  %v1908_v60 = vadd.f32 %v4044_v51, %v78_v56 }
0x2ac6   :  { %v551_v59 = vmax.f32 %v548_v55, 0.0 }
0x2ac7   :  { %2287 = vrot.lane.b32.xlu0 %v4092_v61, %s3532_s23 }
0x2b39   :  { %v2288_v62 = vpop.permute.xlu0 %2287 }
0x2b3a   :  { %2291 = vst.msk [vmem:[#allocation3 + $0x4] sm:$0x1] %vm254_vm2, %v2288_v62  ;;  %3197 = vmatmul.mubr.msk.f32.vlgmr.msra.gmra.mrb[24].mxu0 %vm84_vm1, %v2288_v62 }
0x2b3b   :  { %3376 = vmatpush1.bf16.msra.mxu0 %v3650_v10  ;;  %2511 = vmatprep.mubr.f32.mxu0 %v3528_v8  ;;  %v2443_v10 = vpop.f32.mrb[24].mxu1 }
0x2b3c   :  { %3378 = vmatprep.subr.bf16.mxu0 %v3652_v11  ;;  %v3209_v58 = vpop.f32.mrb[25].mxu1 }
0x2b3f   :  { %3380 = vmatpush1.bf16.msra.mxu0 %v3673_v17 }
0x2b40   :  { %3381 = vmatprep.subr.bf16.mxu0 %v3529_v9 }
0x2b42   :  { %2901 = vmatmul.mubr.msk.f32.vlgmr.msra.gmra.mrb[26].mxu0 %vm84_vm1, %v2288_v62  ;;  %v79_v62 = vld [vmem:[%s4232_s12] sm:$0x1] }
0x2b43   :  { %3383 = vmatpush3.bf16.msra.mxu0 %v3762_v2  ;;  %3223 = vmatprep.mubr.msk.f32.mxu0 %vm3530_vm0, %v3528_v8  ;;  %v552_v58 = vmul.f32 %v551_v59, %v79_v62 }
0x2b44   :  { %3384 = vmatprep.subr.bf16.mxu0 %v3529_v9 }
0x2b47   :  { %3386 = vmatpush3.bf16.msra.mxu0 %v3768_v5  ;;  %v2444_v5 = vadd.f32 %v3477_v0, %v2443_v10  ;;  %v1911_v10 = vmax.f32 %v1908_v60, 0.0 }
0x2c0d   :  { %v4110_v47 = vpop.f32.mrb[24].mxu0 }
0x2c0e   :  { %v3198_v11 = vpop.f32.mrb[25].mxu0 }
0x2c0f   :  { %v554_v11 = vsel %vm553_vm6, %v552_v58, 0.0 }
0x2c15   :  { %v2513_v57 = vpop.f32.mrb[26].mxu0 }
0x2c16   :  { %v2514_v17 = vadd.f32 %v2513_v57, %v3713_v28  ;;  %v2515_v63 = vpop.f32.mrb[27].mxu0  ;;  %v3478_v28 = vld [vmem:[%s4222_s2] sm:$0x1]  ;;  %v1912_v57 = vmul.f32 %v1911_v10, %v79_v62 }
0x2c17   :  { %v2516_v2 = vadd.f32 %v2515_v63, %v3715_v29 }
0x2c18   :  { %2519 = vrot.lane.b32.xlu1 %v2514_v17, %s3531_s19 }
0x2c1c   :  { %2524 = vrot.lane.b32.xlu1 %v2516_v2, %s3531_s19 }
0x2c8a   :  { %v2520_v3 = vpop.permute.xlu1 %2519 }
0x2c8b   :  { %v2522_v50 = vadd.f32 %v2520_v3, %v2444_v5 }
0x2c8d   :  { %v2528_v6 = vmul.f32 %v2522_v50, %v2522_v50  ;;  %v1455_v50 = vadd.f32 %v3977_v35, %v78_v56 }
0x2c8e   :  { %v2525_v36 = vpop.permute.xlu1 %2524 }
0x2c8f   :  { %v2529_v12 = vsel %vm254_vm2, %v2528_v6, 0.0  ;;  %v2527_v22 = vadd.f32 %v2525_v36, %v2444_v5  ;;  %v1458_v6 = vmax.f32 %v1455_v50, 0.0 }
0x2c90   :  { %2530 = vadd.xlane.f32.xlu0 %v2529_v12  ;;  %v2361_v12 = vadd.f32 %v4110_v47, %v78_v56 }
0x2d1d   :  { %v2531_v13 = vpop.xlane.xlu0 %2530 }
0x2d1e   :  { %v2532_v15 = vmul.f32 %v3478_v28, %v2531_v13  ;;  %v2364_v28 = vmax.f32 %v2361_v12, 0.0 }
0x2d20   :  { %3465 = vrsqrt.f32 %v2532_v15 }
0x2d2a   :  { %v3466_v29 = vpop.eup %3465 }
0x2d2b   :  { %v2534_v19 = vmin.f32 %v3466_v29, 1e+08  ;;  %v1459_v29 = vmul.f32 %v1458_v6, %v79_v62 }
0x2d2d   :  { %2536 = vrot.lane.b32.xlu1 %v2534_v19, %s3531_s19  ;;  %v2365_v19 = vmul.f32 %v2364_v28, %v79_v62 }
0x2d2f   :  { %v2366_v36 = vsel %vm553_vm6, %v2365_v19, 0.0 }
0x2d9f   :  { %v2537_v23 = vpop.permute.xlu1 %2536 }
0x2da0   :  { %v2539_v26 = vmul.f32 %v2537_v23, %v2527_v22 }
0x2da2   :  { %v2540_v14 = vsel %vm266_vm3, %v2539_v26, -inf }
0x2da3   :  { %2541 = vmax.xlane.f32.xlu1 %v2540_v14 }
0x2e30   :  { %v2542_v42 = vpop.xlane.xlu1 %2541 }
0x2e31   :  { %v2543_v27 = vsub.f32 %v2539_v26, %v2542_v42 }
0x2e33   :  { %v2544_v30 = vmul.f32 1.442695, %v2543_v27 }
0x2e35   :  { %3467 = vpow2.f32 %v2544_v30 }
0x2e3f   :  { %v3468_v33 = vpop.eup %3467 }
0x2e40   :  { %2547 = vrot.lane.b32.xlu0 %v3468_v33, %s3532_s23 }
0x2eb2   :  { %v2548_v1 = vpop.permute.xlu0 %2547 }
0x2eb3   :  { %v2550_v34 = vsel %vm277_vm4, %v2548_v1, 0.0 }
0x2eb4   :  { %2551 = vadd.xlane.f32.xlu1 %v2550_v34 }
0x2f41   :  { %v2552_v37 = vpop.xlane.xlu1 %2551 }
0x2f42   :  { %3469 = vrcp.f32 %v2552_v37 }
0x2f4c   :  { %v3470_v38 = vpop.eup %3469 }
0x2f4d   :  { %v2554_v31 = vmul.f32 %v3470_v38, %v3468_v33 }
0x2f4f   :  { %2556 = vrot.lane.b32.xlu1 %v2554_v31, %s3532_s23 }
0x2fc1   :  { %v2557_v40 = vpop.permute.xlu1 %2556 }
0x2fc2   :  { %2560 = vst.msk [vmem:[#allocation5 + $0x5] sm:$0x1] %vm277_vm4, %v2557_v40  ;;  %3213 = vmatmul.mubr.msk.f32.vlgmr.msra.gmra.mrb[26].mxu1 %vm288_vm5, %v2557_v40 }
0x2fc3   :  { %3389 = vmatpush3.bf16.msra.mxu1 %v3805_v24  ;;  %3234 = vmatprep.mubr.msk.f32.mxu1 %vm3530_vm0, %v3528_v8  ;;  %v3479_v8 = vld [vmem:[%s4229_s9] sm:$0x1] }
0x2fc4   :  { %3390 = vmatprep.subr.bf16.mxu1 %v3529_v9 }
0x2fc7   :  { %3392 = vmatpush3.bf16.msra.mxu1 %v3811_v25 }
0x3095   :  { %v2629_v41 = vpop.f32.mrb[26].mxu1 }
0x3096   :  { %2634 = vrot.lane.b32.xlu0 %v2629_v41, %s3533_s3  ;;  %v3214_v21 = vpop.f32.mrb[27].mxu1 }
0x3108   :  { %v2635_v4 = vpop.permute.xlu0 %2634 }
0x3109   :  { %v2637_v43 = vadd.f32 %v2635_v4, %v2444_v5  ;;  %v1002_v5 = vadd.f32 %v3910_v7, %v78_v56  ;;  %v80_v7 = vld [vmem:[#allocation2] sm:$0x1] }
0x310b   :  { %v2638_v44 = vmax.f32 %v2637_v43, 0.0  ;;  %v1005_v3 = vmax.f32 %v1002_v5, 0.0 }
0x310d   :  { %2640 = vrot.lane.b32.xlu0 %v2638_v44, %s3534_s0  ;;  %v1006_v13 = vmul.f32 %v1005_v3, %v79_v62 }
0x310f   :  { %v1007_v15 = vsel %vm553_vm6, %v1006_v13, 0.0 }
0x3111   :  { %2721 = vrot.lane.b32.xlu0 %v2514_v17, %s3535_s8 }
0x317f   :  { %v2641_v39 = vpop.permute.xlu0 %2640 }
0x3180   :  { %3224 = vmatmul.mubr.msk.f32.vlgmr.msra.gmra.mrb[28].mxu0 %vm84_vm1, %v2641_v39 }
0x3183   :  { %v2722_v49 = vpop.permute.xlu0 %2721 }
0x3253   :  { %v2710_v24 = vpop.f32.mrb[28].mxu0 }
0x3254   :  { %v2711_v9 = vadd.f32 %v3479_v8, %v2710_v24  ;;  %v3225_v25 = vpop.f32.mrb[29].mxu0 }
0x3256   :  { %v2714_v45 = vadd.f32 %v2711_v9, %v2514_v17  ;;  %v1913_v17 = vsel %vm553_vm6, %v1912_v57, 0.0 }
0x3258   :  { %v2904_v46 = vmul.f32 -1.442695, %v2714_v45 }
0x325a   :  { %3471 = vpow2.f32 %v2904_v46 }
0x3264   :  { %v3472_v48 = vpop.eup %3471 }
0x3265   :  { %v2718_v18 = vadd.f32 1.0, %v3472_v48 }
0x3267   :  { %3473 = vrcp.f32 %v2718_v18 }
0x3271   :  { %v3474_v32 = vpop.eup %3473 }
0x3272   :  { %v2724_v52 = vmul.f32 %v3474_v32, %v2722_v49  ;;  %v2731_v63 = vsub.f32 1.0, %v3474_v32  ;;  %v2737_v54 = vmul.f32 %v3474_v32, %v4092_v61  ;;  %v1460_v61 = vsel %vm553_vm6, %v1459_v29, 0.0 }
0x3274   :  { %2726 = vrot.lane.b32.xlu0 %v2724_v52, %s3535_s8 }
0x32e6   :  { %v2727_v20 = vpop.permute.xlu0 %2726 }
0x32e7   :  { %v2729_v53 = vadd.f32 %v2727_v20, %v2711_v9 }
0x32e9   :  { %3475 = vtanh.f32 %v2729_v53 }
0x32f3   :  { %v3476_v16 = vpop.eup %3475 }
0x32f4   :  { %2733 = vrot.lane.b32.xlu1 %v3476_v16, %s3532_s23 }
0x3318   :  { %555 = vadd.xlane.f32.xlu1 %v554_v11 }
0x331c   :  { %1914 = vadd.xlane.f32.xlu1 %v1913_v17 }
0x3366   :  { %v2734_v2 = vpop.permute.xlu1 %2733 }
0x3367   :  { %v2736_v0 = vmul.f32 %v2734_v2, %v2731_v63 }
0x3369   :  { %v2738_v51 = vadd.f32 %v2737_v54, %v2736_v0 }
0x336b   :  { %2740 = vrot.lane.b32.xlu0 %v2738_v51, %s3532_s23 }
0x338a   :  { %1008 = vadd.xlane.f32.xlu0 %v1007_v15 }
0x338e   :  { %1461 = vadd.xlane.f32.xlu0 %v1460_v61 }
0x3392   :  { %2367 = vadd.xlane.f32.xlu0 %v2366_v36 }
0x33a5   :  { %v556_v22 = vpop.xlane.xlu1 %555 }
0x33a6   :  { %v557_v35 = vadd.f32 %v556_v22, %v80_v7 }
0x33a8   :  { %559 = vst.msk [vmem:[%s4234_s14] sm:$0x1] %vm558_vm7, %v557_v35 }
0x33a9   :  { %v1915_v47 = vpop.xlane.xlu1 %1914 }
0x33aa   :  { %v1916_v23 = vadd.f32 %v1915_v47, %v80_v7 }
0x33ac   :  { %2890 = vst.msk [vmem:[%s4234_s14 + $0x3] sm:$0x1] %vm558_vm7, %v1916_v23 }
0x33dd   :  { %v2741_v26 = vpop.permute.xlu0 %2740 }
0x33de   :  { %2744 = vst.msk [vmem:[#allocation3 + $0x5] sm:$0x1] %vm254_vm2, %v2741_v26  ;;  %3235 = vmatmul.mubr.msk.f32.vlgmr.msra.gmra.mrb[28].mxu1 %vm84_vm1, %v2741_v26 }
0x3417   :  { %v1009_v14 = vpop.xlane.xlu0 %1008 }
0x3418   :  { %v1010_v42 = vadd.f32 %v1009_v14, %v80_v7 }
0x341a   :  { %2874 = vst.msk [vmem:[%s4234_s14 + $0x1] sm:$0x1] %vm558_vm7, %v1010_v42 }
0x341b   :  { %v1462_v27 = vpop.xlane.xlu0 %1461 }
0x341c   :  { %v1463_v30 = vadd.f32 %v1462_v27, %v80_v7 }
0x341e   :  { %2882 = vst.msk [vmem:[%s4234_s14 + $0x2] sm:$0x1] %vm558_vm7, %v1463_v30 }
0x341f   :  { %v2368_v33 = vpop.xlane.xlu0 %2367 }
0x3420   :  { %v2369_v1 = vadd.f32 %v2368_v33, %v80_v7 }
0x3422   :  { %2898 = vst.msk [vmem:[%s4234_s14 + $0x4] sm:$0x1] %vm558_vm7, %v2369_v1 }
0x34b1   :  { %v2813_v34 = vpop.f32.mrb[28].mxu1 }
0x34b2   :  { %v2814_v37 = vadd.f32 %v2813_v34, %v78_v56  ;;  %v3236_v38 = vpop.f32.mrb[29].mxu1 }
0x34b4   :  { %v2817_v31 = vmax.f32 %v2814_v37, 0.0 }
0x34b6   :  { %v2818_v40 = vmul.f32 %v2817_v31, %v79_v62 }
0x34b8   :  { %v2819_v41 = vsel %vm553_vm6, %v2818_v40, 0.0 }
0x34b9   :  { %2820 = vadd.xlane.f32.xlu1 %v2819_v41 }
0x34ba   :  { %3491 = shalt.err (!%p3488_p4)
}
0x34bb   :  { %s3492_s6 = scalar_lea.hbm %s4235_s15, 96 }
0x34bc   :  { %p3493_p5 = scmp.ne.s32.totalorder %s4235_s15, %s3492_s6  ;;  %p3496_p6 = scmp.lt.u32.totalorder %s3492_s6, %s4235_s15 }
0x34be   :  { %p3498_p7 = pnand %p3496_p6, %p3493_p5 }
0x34c0   :  { %3501 = shalt.err (!%p3498_p7)
}
0x34c1   :  { %s3538_s2 = smov 16   ;;  %s3539_s4 = smov 1  }
0x34c2   :  { %2838 = dma.vmem_to_hbm [thread:$0]  %s2833_s5, 96, %s4235_s15, [#allocation4], %s3538_s2, %s3538_s2, %s3539_s4  }
0x34c3   :  { %s3502_s3 = scalar_lea.vmem %s4185_s30, 96  ;;  %p3507_p9 = scmp.lt.s32.totalorder %s4185_s30, %s4185_s30 }
0x34c4   :  { %p3503_p8 = scmp.ne.s32.totalorder %s4185_s30, %s3502_s3  ;;  %p3508_p10 = scmp.lt.s32.totalorder %s3502_s3, %s3502_s3 }
0x34c6   :  { %p3509_p11 = por %p3508_p10, %p3507_p9 }
0x34c8   :  { %p3510_p12 = pnand %p3509_p11, %p3503_p8 }
0x34ca   :  { %3513 = shalt.err (!%p3510_p12)
}
0x34cb   :  { %s3514_s12 = scalar_lea.hbm %s4236_s16, 96 }
0x34cc   :  { %p3515_p13 = scmp.ne.s32.totalorder %s4236_s16, %s3514_s12  ;;  %p3518_p0 = scmp.lt.u32.totalorder %s3514_s12, %s4236_s16 }
0x34ce   :  { %p3520_p1 = pnand %p3518_p0, %p3515_p13 }
0x34d0   :  { %3523 = shalt.err (!%p3520_p1)
}
0x34d1   :  { %2850 = dma.vmem_to_hbm [thread:$0]  %s4185_s30, 96, %s4236_s16, [#allocation6], %s3538_s2, %s3538_s2, %s3539_s4  }
0x3546   :  { %v2821_v21 = vpop.xlane.xlu1 %2820 }
0x3547   :  { %v2822_v4 = vadd.f32 %v2821_v21, %v80_v7 }
0x3549   :  { %2906 = vst.msk [vmem:[%s4234_s14 + $0x5] sm:$0x1] %vm558_vm7, %v2822_v4 }
0x354a   :  { %3524 = dma.done.wait [#allocation4], 96  }
0x354b   :  { %3525 = vsyncadd [#allocation4], 4294967200 }
0x354c   :  { %3526 = dma.done.wait [#allocation6], 96  }
0x354d   :  { %3527 = vsyncadd [#allocation6], 4294967200 }
0x354e   :  { %2859 = vsyncpa [#allocation4], 1 }
0x354f   :  { %2860 = vsyncpa [#allocation6], 1 }

</bundles_post_ra>
